<compile_context>
chip_gen: v6e
topology: v6e:2x2x1
jax: 0.10.0
libtpu: 0.0.40
codegen_flags: <defaults>
</compile_context>

<pallas_src>
import math
import functools

import jax
import jax.numpy as jnp
from jax.experimental import pallas as pl
from jax.experimental.pallas import tpu as pltpu


def _gelu_exact(x):
    # F.gelu default = exact erf formulation.
    return 0.5 * x * (1.0 + jax.lax.erf(x * (1.0 / math.sqrt(2.0))))


def _cdiv(a, b):
    return (a + b - 1) // b


def _round_up(x, m):
    return _cdiv(x, m) * m


def _se3_kernel(dist_ref, idx_ref, mul_ref, bias_ref, mean_ref,
                w1_ref, b1_ref, w2_ref, b2_ref, o_ref,
                *, inv_std, gauss_coeff, feat_dtype):
    tm = dist_ref.shape[0]
    num_pair = mul_ref.shape[-1]

    # ---- embedding combine (exact one-hot on VPU + lane reduce; matches gather+sum) ----
    idx = idx_ref[...]                                              # (tm, P) int32
    iota = jax.lax.broadcasted_iota(jnp.int32, (tm, num_pair), 1)   # (tm, num_pair)
    counts = jnp.zeros((tm, num_pair), jnp.float32)
    for c in range(idx.shape[-1]):                                  # P is tiny (2), unrolled
        counts = counts + (idx[:, c:c + 1] == iota).astype(jnp.float32)
    scale = jnp.sum(counts * mul_ref[...], axis=-1, keepdims=True)   # sum |mul_w[idx]|, (tm,1)
    shift = jnp.sum(counts * bias_ref[...], axis=-1, keepdims=True)  # sum  bias_w[idx], (tm,1)

    # ---- Gaussian basis expansion (f32, as in the torch.jit gaussian()) ----
    t = scale * dist_ref[...] + shift                               # (tm, 1)
    z = (t - mean_ref[...]) * inv_std                               # (tm, K) broadcast
    g = jnp.exp(-0.5 * (z * z)) * gauss_coeff                       # (tm, K)
    if jnp.dtype(feat_dtype) != jnp.float32:
        g = g.astype(feat_dtype).astype(jnp.float32)                # .to(dist.dtype) in torch

    # ---- out_proj: Linear(K,K) -> exact GELU -> Linear(K, pair_dim) ----
    h = jnp.dot(g, w1_ref[...], preferred_element_type=jnp.float32) + b1_ref[...]
    h = _gelu_exact(h)
    out = jnp.dot(h, w2_ref[...], preferred_element_type=jnp.float32) + b2_ref[...]
    o_ref[...] = out.astype(o_ref.dtype)


@functools.partial(jax.jit, static_argnames=("std", "tm"))
def se3_invariant_kernel_forward(dist, atom_pair, mul_w, bias_w, mean,
                                 w1, b1, w2, b2, *, std, tm=1024):
    """dist: (N,) ; atom_pair: (N, P) int ; mul_w/bias_w: (num_pair, 1) ;
    mean: (K,) ; w1: (K, K), b1: (K,) ; w2: (pair_dim, K), b2: (pair_dim,)."""
    n = dist.shape[0]
    num_pair = mul_w.shape[0]
    k = mean.shape[0]
    pair_dim = w2.shape[0]
    p = atom_pair.shape[-1]
    feat_dtype = dist.dtype

    # Row tile: as large as possible, but keep >= 2 grid steps when there is enough work so
    # both v7x TensorCores get a share via the "parallel" grid axis.
    tm_eff = min(tm, _round_up(n, 8))
    if _cdiv(n, tm_eff) < 2 and n > 8:
        tm_eff = _round_up(_cdiv(n, 2), 8)
    n_pad = _round_up(n, tm_eff)

    dist2d = dist.astype(jnp.float32).reshape(n, 1)
    idx = atom_pair.astype(jnp.int32)
    if n_pad != n:                                   # pad rows instead of asserting
        dist2d = jnp.pad(dist2d, ((0, n_pad - n), (0, 0)))
        idx = jnp.pad(idx, ((0, n_pad - n), (0, 0)))

    # Hoist parameter casts / reshapes out of the hot loop (blocks are grid-invariant).
    mul_row = jnp.abs(mul_w).astype(jnp.float32).reshape(1, num_pair)
    bias_row = bias_w.astype(jnp.float32).reshape(1, num_pair)
    mean_row = mean.astype(jnp.float32).reshape(1, k)
    w1t = w1.astype(jnp.float32).T                   # (K, K)
    w2t = w2.astype(jnp.float32).T                   # (K, pair_dim)
    b1r = b1.astype(jnp.float32).reshape(1, k)
    b2r = b2.astype(jnp.float32).reshape(1, pair_dim)

    a = (2.0 * 3.14159) ** 0.5                       # same pi approximation as the module
    kern = functools.partial(
        _se3_kernel,
        inv_std=float(1.0 / std),
        gauss_coeff=float(1.0 / (a * std)),
        feat_dtype=feat_dtype,
    )

    out = pl.pallas_call(
        kern,
        out_shape=jax.ShapeDtypeStruct((n_pad, pair_dim), feat_dtype),
        grid_spec=pltpu.PrefetchScalarGridSpec(
            num_scalar_prefetch=0,
            grid=(n_pad // tm_eff,),
            in_specs=[
                pl.BlockSpec((tm_eff, 1), lambda i: (i, 0)),     # dist rows
                pl.BlockSpec((tm_eff, p), lambda i: (i, 0)),     # atom_pair indices
                pl.BlockSpec((1, num_pair), lambda i: (0, 0)),   # |mul| embedding table
                pl.BlockSpec((1, num_pair), lambda i: (0, 0)),   # bias embedding table
                pl.BlockSpec((1, k), lambda i: (0, 0)),          # gaussian means
                pl.BlockSpec((k, k), lambda i: (0, 0)),          # W1.T (resident)
                pl.BlockSpec((1, k), lambda i: (0, 0)),          # b1
                pl.BlockSpec((k, pair_dim), lambda i: (0, 0)),   # W2.T (resident)
                pl.BlockSpec((1, pair_dim), lambda i: (0, 0)),   # b2
            ],
            out_specs=pl.BlockSpec((tm_eff, pair_dim), lambda i: (i, 0)),
        ),
        compiler_params=pltpu.CompilerParams(
            dimension_semantics=("parallel",)),
    )(dist2d, idx, mul_row, bias_row, mean_row, w1t, b1r, w2t, b2r)
    return out[:n]


def _reference(dist, atom_pair, mul_w, bias_w, mean, std, w1, b1, w2, b2):
    """Pure-JAX mirror of SE3InvariantKernel.forward."""
    mulv = jnp.abs(mul_w[atom_pair]).sum(axis=-2)                    # (N, 1)
    biasv = bias_w[atom_pair].sum(axis=-2)                           # (N, 1)
    x = mulv * dist.astype(jnp.float32)[:, None] + biasv             # (N, 1)
    x = jnp.broadcast_to(x, (dist.shape[0], mean.shape[0]))          # (N, K)
    a = (2.0 * 3.14159) ** 0.5
    inv_std = 1.0 / std
    z = (x - mean[None, :].astype(jnp.float32)) * inv_std
    g = jnp.exp(-0.5 * (z * z)) * (1.0 / (a * std))
    g = g.astype(dist.dtype).astype(jnp.float32)
    h = g @ w1.T.astype(jnp.float32) + b1
    h = _gelu_exact(h)
    out = h @ w2.T.astype(jnp.float32) + b2
    return out.astype(dist.dtype)


if __name__ == "__main__":
    # Small shapes: 2 "graphs" of 13 nodes -> 338 edges (exercises the row-padding and
    # grid-splitting paths), num_kernel K = 128 (module default), pair_dim = 128,
    # num_pair = 16.
    num_kernel = 128
    pair_dim = 128
    num_pair = 16
    batch, nodes = 2, 13
    n_edges = batch * nodes * nodes          # 338

    key = jax.random.PRNGKey(0)
    kd, kp, km, kb, k1, k2, kb1, kb2 = jax.random.split(key, 8)

    dist = jnp.abs(jax.random.normal(kd, (n_edges,), dtype=jnp.float32)) * 3.0
    atom_pair = jax.random.randint(kp, (n_edges, 2), 0, num_pair, dtype=jnp.int32)

    # GaussianKernel hyperparams (module defaults).
    start, stop, std_width = 0.0, 9.0, 1.0
    mean = jnp.linspace(start, stop, num_kernel, dtype=jnp.float32)
    std = float(std_width * (stop - start) / (num_kernel - 1))

    # Embedding(num_pair, 1) tables.  Real init is mul=1 / bias=0 with padding row 0 zeroed;
    # we use small random values so the kernel exercises a non-trivial compute path.
    mul_w = (1.0 + 0.2 * jax.random.normal(km, (num_pair, 1), dtype=jnp.float32)).at[0].set(0.0)
    bias_w = (0.1 * jax.random.normal(kb, (num_pair, 1), dtype=jnp.float32)).at[0].set(0.0)

    # NonLinear(num_kernel, pair_dim) = Linear(K, K) -> GELU -> Linear(K, pair_dim).
    # NOTE: real init is trunc-normal ('relu') for layer1 and zeros ('final') for layer2;
    # random values are used here so the output is non-trivial.
    s1 = math.sqrt(2.0 / num_kernel)
    w1 = s1 * jax.random.normal(k1, (num_kernel, num_kernel), dtype=jnp.float32)   # (out, in)
    b1 = 0.02 * jax.random.normal(kb1, (num_kernel,), dtype=jnp.float32)
    w2 = s1 * jax.random.normal(k2, (pair_dim, num_kernel), dtype=jnp.float32)     # (out, in)
    b2 = 0.02 * jax.random.normal(kb2, (pair_dim,), dtype=jnp.float32)

    out = se3_invariant_kernel_forward(dist, atom_pair, mul_w, bias_w, mean,
                                       w1, b1, w2, b2, std=std, tm=1024)
    out = jax.block_until_ready(out)

    ref = _reference(dist, atom_pair, mul_w, bias_w, mean, std, w1, b1, w2, b2)
    assert out.shape == (n_edges, pair_dim) and out.dtype == dist.dtype
    max_err = jnp.max(jnp.abs(out - ref))
    assert jnp.allclose(out, ref, atol=2e-4, rtol=2e-4), f"max abs err {max_err}"

    print("KERNEL_OK")
</pallas_src>

<mosaic_0001>
module attributes {stable_mosaic.version = 11 : i64} {
  func.func @_se3_kernel(%arg0: i32, %arg1: memref<176x1xf32, #tpu.memory_space<vmem>>, %arg2: memref<176x2xi32, #tpu.memory_space<vmem>>, %arg3: memref<1x16xf32, #tpu.memory_space<vmem>>, %arg4: memref<1x16xf32, #tpu.memory_space<vmem>>, %arg5: memref<1x128xf32, #tpu.memory_space<vmem>>, %arg6: memref<128x128xf32, #tpu.memory_space<vmem>>, %arg7: memref<1x128xf32, #tpu.memory_space<vmem>>, %arg8: memref<128x128xf32, #tpu.memory_space<vmem>>, %arg9: memref<1x128xf32, #tpu.memory_space<vmem>>, %arg10: memref<176x128xf32, #tpu.memory_space<vmem>>) attributes {dimension_semantics = [#tpu.dimension_semantics<parallel>], iteration_bounds = array<i64: 2>, scalar_prefetch = 0 : i64, scratch_operands = 0 : i64, tpu.core_type = #tpu.core_type<tc>, window_params = [{transform_indices = @transform_0, window_bounds = array<i64: 176, 1>}, {transform_indices = @transform_1, window_bounds = array<i64: 176, 2>}, {pipeline_mode = #tpu.pipeline_mode<synchronous>, transform_indices = @transform_2, window_bounds = array<i64: 1, 16>}, {pipeline_mode = #tpu.pipeline_mode<synchronous>, transform_indices = @transform_3, window_bounds = array<i64: 1, 16>}, {pipeline_mode = #tpu.pipeline_mode<synchronous>, transform_indices = @transform_4, window_bounds = array<i64: 1, 128>}, {pipeline_mode = #tpu.pipeline_mode<synchronous>, transform_indices = @transform_5, window_bounds = array<i64: 128, 128>}, {pipeline_mode = #tpu.pipeline_mode<synchronous>, transform_indices = @transform_6, window_bounds = array<i64: 1, 128>}, {pipeline_mode = #tpu.pipeline_mode<synchronous>, transform_indices = @transform_7, window_bounds = array<i64: 128, 128>}, {pipeline_mode = #tpu.pipeline_mode<synchronous>, transform_indices = @transform_8, window_bounds = array<i64: 1, 128>}, {transform_indices = @transform_9, window_bounds = array<i64: 176, 128>}]} {
    %c0 = arith.constant 0 : index
    %c0_0 = arith.constant 0 : index
    %0 = vector.load %arg2[%c0, %c0_0] : memref<176x2xi32, #tpu.memory_space<vmem>>, vector<176x2xi32>
    %1 = tpu.iota {dimensions = array<i32: 1>} : vector<176x16xi32>
    %cst = arith.constant 0.000000e+00 : f32
    %2 = vector.broadcast %cst : f32 to vector<176x16xf32>
    %3 = vector.extract_strided_slice %0 {offsets = [0, 0], sizes = [176, 1], strides = [1, 1]} : vector<176x2xi32> to vector<176x1xi32>
    %4 = vector.broadcast %3 : vector<176x1xi32> to vector<176x16xi32>
    %5 = arith.cmpi eq, %4, %1 : vector<176x16xi32>
    %6 = arith.extui %5 : vector<176x16xi1> to vector<176x16xi32>
    %7 = arith.sitofp %6 : vector<176x16xi32> to vector<176x16xf32>
    %8 = arith.addf %2, %7 : vector<176x16xf32>
    %9 = vector.extract_strided_slice %0 {offsets = [0, 1], sizes = [176, 1], strides = [1, 1]} : vector<176x2xi32> to vector<176x1xi32>
    %10 = vector.broadcast %9 : vector<176x1xi32> to vector<176x16xi32>
    %11 = arith.cmpi eq, %10, %1 : vector<176x16xi32>
    %12 = arith.extui %11 : vector<176x16xi1> to vector<176x16xi32>
    %13 = arith.sitofp %12 : vector<176x16xi32> to vector<176x16xf32>
    %14 = arith.addf %8, %13 : vector<176x16xf32>
    %c0_1 = arith.constant 0 : index
    %c0_2 = arith.constant 0 : index
    %15 = vector.load %arg3[%c0_1, %c0_2] : memref<1x16xf32, #tpu.memory_space<vmem>>, vector<1x16xf32>
    %16 = vector.broadcast %15 : vector<1x16xf32> to vector<176x16xf32>
    %17 = arith.mulf %14, %16 : vector<176x16xf32>
    %cst_3 = arith.constant dense<0.000000e+00> : vector<176xf32>
    %18 = vector.multi_reduction <add>, %17, %cst_3 [1] : vector<176x16xf32> to vector<176xf32>
    %19 = vector.shape_cast %18 : vector<176xf32> to vector<176x1xf32>
    %c0_4 = arith.constant 0 : index
    %c0_5 = arith.constant 0 : index
    %20 = vector.load %arg4[%c0_4, %c0_5] : memref<1x16xf32, #tpu.memory_space<vmem>>, vector<1x16xf32>
    %21 = vector.broadcast %20 : vector<1x16xf32> to vector<176x16xf32>
    %22 = arith.mulf %14, %21 : vector<176x16xf32>
    %cst_6 = arith.constant dense<0.000000e+00> : vector<176xf32>
    %23 = vector.multi_reduction <add>, %22, %cst_6 [1] : vector<176x16xf32> to vector<176xf32>
    %24 = vector.shape_cast %23 : vector<176xf32> to vector<176x1xf32>
    %c0_7 = arith.constant 0 : index
    %c0_8 = arith.constant 0 : index
    %25 = vector.load %arg1[%c0_7, %c0_8] : memref<176x1xf32, #tpu.memory_space<vmem>>, vector<176x1xf32>
    %26 = arith.mulf %19, %25 : vector<176x1xf32>
    %27 = arith.addf %26, %24 : vector<176x1xf32>
    %c0_9 = arith.constant 0 : index
    %c0_10 = arith.constant 0 : index
    %28 = vector.load %arg5[%c0_9, %c0_10] : memref<1x128xf32, #tpu.memory_space<vmem>>, vector<1x128xf32>
    %29 = vector.broadcast %27 : vector<176x1xf32> to vector<176x128xf32>
    %30 = vector.broadcast %28 : vector<1x128xf32> to vector<176x128xf32>
    %31 = arith.subf %29, %30 : vector<176x128xf32>
    %cst_11 = arith.constant 14.1111107 : f32
    %32 = vector.broadcast %cst_11 : f32 to vector<176x128xf32>
    %33 = arith.mulf %31, %32 : vector<176x128xf32>
    %34 = arith.mulf %33, %33 : vector<176x128xf32>
    %cst_12 = arith.constant -5.000000e-01 : f32
    %35 = vector.broadcast %cst_12 : f32 to vector<176x128xf32>
    %36 = arith.mulf %35, %34 : vector<176x128xf32>
    %37 = math.exp %36 : vector<176x128xf32>
    %cst_13 = arith.constant 5.62952137 : f32
    %38 = vector.broadcast %cst_13 : f32 to vector<176x128xf32>
    %39 = arith.mulf %37, %38 : vector<176x128xf32>
    %c0_14 = arith.constant 0 : index
    %c0_15 = arith.constant 0 : index
    %40 = vector.load %arg6[%c0_14, %c0_15] : memref<128x128xf32, #tpu.memory_space<vmem>>, vector<128x128xf32>
    %cst_16 = arith.constant dense<0.000000e+00> : vector<176x128xf32>
    %41 = tpu.matmul %39, %40, %cst_16 {dimension_numbers = #tpu.dot_dimension_numbers<[1], [0], [0], [1], [0, 0, 1, 1], [], []>} : vector<176x128xf32>, vector<128x128xf32>, vector<176x128xf32> -> vector<176x128xf32>
    %c0_17 = arith.constant 0 : index
    %c0_18 = arith.constant 0 : index
    %42 = vector.load %arg7[%c0_17, %c0_18] : memref<1x128xf32, #tpu.memory_space<vmem>>, vector<1x128xf32>
    %43 = vector.broadcast %42 : vector<1x128xf32> to vector<176x128xf32>
    %44 = arith.addf %41, %43 : vector<176x128xf32>
    %cst_19 = arith.constant 5.000000e-01 : f32
    %45 = vector.broadcast %cst_19 : f32 to vector<176x128xf32>
    %46 = arith.mulf %45, %44 : vector<176x128xf32>
    %cst_20 = arith.constant 0.707106769 : f32
    %47 = vector.broadcast %cst_20 : f32 to vector<176x128xf32>
    %48 = arith.mulf %44, %47 : vector<176x128xf32>
    %49 = math.erf %48 : vector<176x128xf32>
    %cst_21 = arith.constant 1.000000e+00 : f32
    %50 = vector.broadcast %cst_21 : f32 to vector<176x128xf32>
    %51 = arith.addf %50, %49 : vector<176x128xf32>
    %52 = arith.mulf %46, %51 : vector<176x128xf32>
    %c0_22 = arith.constant 0 : index
    %c0_23 = arith.constant 0 : index
    %53 = vector.load %arg8[%c0_22, %c0_23] : memref<128x128xf32, #tpu.memory_space<vmem>>, vector<128x128xf32>
    %cst_24 = arith.constant dense<0.000000e+00> : vector<176x128xf32>
    %54 = tpu.matmul %52, %53, %cst_24 {dimension_numbers = #tpu.dot_dimension_numbers<[1], [0], [0], [1], [0, 0, 1, 1], [], []>} : vector<176x128xf32>, vector<128x128xf32>, vector<176x128xf32> -> vector<176x128xf32>
    %c0_25 = arith.constant 0 : index
    %c0_26 = arith.constant 0 : index
    %55 = vector.load %arg9[%c0_25, %c0_26] : memref<1x128xf32, #tpu.memory_space<vmem>>, vector<1x128xf32>
    %56 = vector.broadcast %55 : vector<1x128xf32> to vector<176x128xf32>
    %57 = arith.addf %54, %56 : vector<176x128xf32>
    %c0_27 = arith.constant 0 : index
    %c0_28 = arith.constant 0 : index
    %58 = vector.load %arg10[%c0_27, %c0_28] : memref<176x128xf32, #tpu.memory_space<vmem>>, vector<176x128xf32>
    tpu.vector_store %arg10[%c0_27, %c0_28], %57 {strides = array<i32>} : memref<176x128xf32, #tpu.memory_space<vmem>>, vector<176x128xf32>,
    return
  }
  func.func @transform_0(%arg0: i32) -> (i32, i32) {
    %c0_i32 = arith.constant 0 : i32
    %c0_i32_0 = arith.constant 0 : i32
    return %arg0, %c0_i32 : i32, i32
  }
  func.func @transform_1(%arg0: i32) -> (i32, i32) {
    %c0_i32 = arith.constant 0 : i32
    %c0_i32_0 = arith.constant 0 : i32
    return %arg0, %c0_i32 : i32, i32
  }
  func.func @transform_2(%arg0: i32) -> (i32, i32) {
    %c0_i32 = arith.constant 0 : i32
    %c0_i32_0 = arith.constant 0 : i32
    %c0_i32_1 = arith.constant 0 : i32
    return %c0_i32, %c0_i32_0 : i32, i32
  }
  func.func @transform_3(%arg0: i32) -> (i32, i32) {
    %c0_i32 = arith.constant 0 : i32
    %c0_i32_0 = arith.constant 0 : i32
    %c0_i32_1 = arith.constant 0 : i32
    return %c0_i32, %c0_i32_0 : i32, i32
  }
  func.func @transform_4(%arg0: i32) -> (i32, i32) {
    %c0_i32 = arith.constant 0 : i32
    %c0_i32_0 = arith.constant 0 : i32
    %c0_i32_1 = arith.constant 0 : i32
    return %c0_i32, %c0_i32_0 : i32, i32
  }
  func.func @transform_5(%arg0: i32) -> (i32, i32) {
    %c0_i32 = arith.constant 0 : i32
    %c0_i32_0 = arith.constant 0 : i32
    %c0_i32_1 = arith.constant 0 : i32
    return %c0_i32, %c0_i32_0 : i32, i32
  }
  func.func @transform_6(%arg0: i32) -> (i32, i32) {
    %c0_i32 = arith.constant 0 : i32
    %c0_i32_0 = arith.constant 0 : i32
    %c0_i32_1 = arith.constant 0 : i32
    return %c0_i32, %c0_i32_0 : i32, i32
  }
  func.func @transform_7(%arg0: i32) -> (i32, i32) {
    %c0_i32 = arith.constant 0 : i32
    %c0_i32_0 = arith.constant 0 : i32
    %c0_i32_1 = arith.constant 0 : i32
    return %c0_i32, %c0_i32_0 : i32, i32
  }
  func.func @transform_8(%arg0: i32) -> (i32, i32) {
    %c0_i32 = arith.constant 0 : i32
    %c0_i32_0 = arith.constant 0 : i32
    %c0_i32_1 = arith.constant 0 : i32
    return %c0_i32, %c0_i32_0 : i32, i32
  }
  func.func @transform_9(%arg0: i32) -> (i32, i32) {
    %c0_i32 = arith.constant 0 : i32
    %c0_i32_0 = arith.constant 0 : i32
    return %arg0, %c0_i32 : i32, i32
  }
}

</mosaic_0001>

<bundles_post_ra>
// kernel: se3_invariant_kernel_forward.1
= control target key start
LH: loop header
LB: loop body
LE: loop exit
PB: predicated region body
PF: predicated region fallthrough
CT: control target
= control target key end

     0   :  { %s2245_s30 = smov 0   ;;  %s2711_s0 = inlined_call_operand.vmem [shape: f32[352,1], index: 0, kind: input, shape index: {}]   ;;  %s2712_s1 = inlined_call_operand.vmem [shape: s32[352,2], index: 1, kind: input, shape index: {}]   ;;  %s2713_s2 = inlined_call_operand.vmem [shape: f32[1,16], index: 2, kind: input, shape index: {}]   ;;  %s2714_s3 = inlined_call_operand.vmem [shape: f32[1,16], index: 3, kind: input, shape index: {}]   ;;  %s2715_s4 = inlined_call_operand.vmem [shape: f32[1,128], index: 4, kind: input, shape index: {}]   ;;  %s2716_s5 = inlined_call_operand.vmem [shape: f32[128,128], index: 5, kind: input, shape index: {}]   ;;  %s2717_s6 = inlined_call_operand.vmem [shape: f32[1,128], index: 6, kind: input, shape index: {}]   ;;  %s2718_s7 = inlined_call_operand.vmem [shape: f32[128,128], index: 7, kind: input, shape index: {}]   ;;  %s2719_s8 = inlined_call_operand.vmem [shape: f32[1,128], index: 8, kind: input, shape index: {}]   ;;  %s2720_s9 = inlined_call_operand.vmem [shape: f32[352,128], index: 9, kind: output, shape index: {}]  }
   0x1 LB: > { %s1814_s10 = sadd.s32 4294967295, %s2190_s30   ;;  %p1818_p0 = scmp.ge.s32.totalorder %s2190_s30, 1  ;;  %s2190_s30 = sphi %s2245_s30, %s19_s30  }
   0x2   : > { %p299_p1 = scmp.lt.s32.totalorder %s2190_s30, 3 }
   0x4   : > { %p300_p2 = pnand %p1818_p0, %p299_p1 }
   0x5   : > { %s340_s11 = smul.u32 (!%p300_p2), 22, %s1814_s10 }
   0x6   : > { %303 = sbr.rel (%p300_p2) target bundleno = 942 (0x3ae), region = 56 }
   0x7   : > { %p341_p3 = scmp.lt.s32.totalorder (!%p300_p2), %s340_s11, 43 }
   0xb   : > { %v2192_v0 = vmov 0   ;;  %s2722_s11 = smov (!%p341_p3, %s340_s11), 43  ;;  %v2193_v3 = vmov 1   ;;  %v380_v24 = vlaneseq  ;;  %v2194_v30 = vmov 0.0   ;;  %v2300_v35 = vld [vmem:[%s2713_s2] ss:$0 sm:$0xff] }
   0xc   : > { %2092 = vset.pattern.permute.xlu1 %v2192_v0  ;;  %2090 = vset.pattern.permute.xlu0 %v2192_v0  ;;  %s2255_s12 = sshll.u32 %s2722_s11, 3  ;;  %v2305_v38 = vld [vmem:[%s2714_s3] ss:$0 sm:$0xff]  ;;  %vm719_vm4 = vcmask 130048  }
   0xd   : > { %s2261_s15 = scalar_lea.vmem %s2712_s1, %s2255_s12  ;;  %v2287_v25 = vand.u32 127, %v380_v24  ;;  %s2488_s28 = scalar_lea.vmem %s2711_s0, %s2255_s12 }
   0xe   : > { %v359_v1 = vld [vmem:[%s2261_s15 + $0x8] sm:$0xff]  ;;  %v358_v2 = vld [vmem:[%s2261_s15] sm:$0xff]  ;;  %v360_v4 = vld [vmem:[%s2261_s15 + $0x10] sm:$0xff]  ;;  %s2662_s20 = scalar_lea.vmem %s2720_s9, %s2255_s12 }
   0xf   : > { %386 = vperm.xlu1 %2092, %v359_v1   ;;  %383 = vperm.xlu0 %2090, %v358_v2   ;;  %v361_v5 = vld [vmem:[%s2261_s15 + $0x18] sm:$0xff]  ;;  %v362_v6 = vld [vmem:[%s2261_s15 + $0x20] sm:$0xff]  ;;  %v363_v7 = vld [vmem:[%s2261_s15 + $0x28] sm:$0xff] }
  0x10   : > { %v364_v8 = vld [vmem:[%s2261_s15 + $0x30] sm:$0xff]  ;;  %v365_v9 = vld [vmem:[%s2261_s15 + $0x38] sm:$0xff]  ;;  %v366_v10 = vld [vmem:[%s2261_s15 + $0x40] sm:$0xff] }
  0x11   : > { %v367_v11 = vld [vmem:[%s2261_s15 + $0x48] sm:$0xff]  ;;  %v368_v12 = vld [vmem:[%s2261_s15 + $0x50] sm:$0xff]  ;;  %v369_v13 = vld [vmem:[%s2261_s15 + $0x58] sm:$0xff] }
  0x12   : > { %v370_v14 = vld [vmem:[%s2261_s15 + $0x60] sm:$0xff]  ;;  %v371_v15 = vld [vmem:[%s2261_s15 + $0x68] sm:$0xff]  ;;  %v372_v16 = vld [vmem:[%s2261_s15 + $0x70] sm:$0xff] }
  0x13   : > { %2093 = vset.pattern.permute.xlu1 %v2193_v3  ;;  %2091 = vset.pattern.permute.xlu0 %v2193_v3  ;;  %v373_v17 = vld [vmem:[%s2261_s15 + $0x78] sm:$0xff]  ;;  %v374_v18 = vld [vmem:[%s2261_s15 + $0x80] sm:$0xff]  ;;  %v375_v19 = vld [vmem:[%s2261_s15 + $0x88] sm:$0xff] }
  0x14   : > { %540 = vperm.xlu1 %2093, %v359_v1   ;;  %537 = vperm.xlu0 %2091, %v358_v2   ;;  %v376_v20 = vld [vmem:[%s2261_s15 + $0x90] sm:$0xff]  ;;  %v377_v21 = vld [vmem:[%s2261_s15 + $0x98] sm:$0xff]  ;;  %v378_v22 = vld [vmem:[%s2261_s15 + $0xa0] sm:$0xff] }
  0x15   : > { %v379_v23 = vld [vmem:[%s2261_s15 + $0xa8] sm:$0xff] }
  0x18   : > { %2094 = vset.pattern.permute.xlu1 %v2192_v0  ;;  %543 = vperm.xlu0 %2091, %v360_v4  }
  0x19   : > { %389 = vperm.xlu1 %2094, %v360_v4  }
  0x1c   : > { %546 = vperm.xlu0 %2091, %v361_v5  }
  0x1d   : > { %392 = vperm.xlu1 %2094, %v361_v5  }
  0x20   : > { %549 = vperm.xlu0 %2091, %v362_v6  }
  0x21   : > { %395 = vperm.xlu1 %2094, %v362_v6  }
  0x24   : > { %552 = vperm.xlu0 %2091, %v363_v7  }
  0x25   : > { %398 = vperm.xlu1 %2094, %v363_v7  }
  0x28   : > { %555 = vperm.xlu0 %2091, %v364_v8  }
  0x29   : > { %401 = vperm.xlu1 %2094, %v364_v8  }
  0x2c   : > { %558 = vperm.xlu0 %2091, %v365_v9  }
  0x2d   : > { %404 = vperm.xlu1 %2094, %v365_v9  }
  0x30   : > { %561 = vperm.xlu0 %2091, %v366_v10  }
  0x31   : > { %407 = vperm.xlu1 %2094, %v366_v10  }
  0x34   : > { %564 = vperm.xlu0 %2091, %v367_v11  }
  0x35   : > { %410 = vperm.xlu1 %2094, %v367_v11  }
  0x38   : > { %567 = vperm.xlu0 %2091, %v368_v12  }
  0x39   : > { %413 = vperm.xlu1 %2094, %v368_v12  }
  0x3c   : > { %570 = vperm.xlu0 %2091, %v369_v13  }
  0x3d   : > { %416 = vperm.xlu1 %2094, %v369_v13  }
  0x40   : > { %573 = vperm.xlu0 %2091, %v370_v14  }
  0x41   : > { %419 = vperm.xlu1 %2094, %v370_v14  }
  0x44   : > { %576 = vperm.xlu0 %2091, %v371_v15  }
  0x45   : > { %422 = vperm.xlu1 %2094, %v371_v15  }
  0x48   : > { %579 = vperm.xlu0 %2091, %v372_v16  }
  0x49   : > { %425 = vperm.xlu1 %2094, %v372_v16  }
  0x4c   : > { %582 = vperm.xlu0 %2091, %v373_v17  }
  0x4d   : > { %428 = vperm.xlu1 %2094, %v373_v17  }
  0x50   : > { %585 = vperm.xlu0 %2091, %v374_v18  }
  0x51   : > { %431 = vperm.xlu1 %2094, %v374_v18  }
  0x54   : > { %588 = vperm.xlu0 %2091, %v375_v19  }
  0x55   : > { %434 = vperm.xlu1 %2094, %v375_v19  }
  0x58   : > { %591 = vperm.xlu0 %2091, %v376_v20  }
  0x59   : > { %437 = vperm.xlu1 %2094, %v376_v20  }
  0x5c   : > { %594 = vperm.xlu0 %2091, %v377_v21  }
  0x5d   : > { %440 = vperm.xlu1 %2094, %v377_v21  }
  0x60   : > { %597 = vperm.xlu0 %2091, %v378_v22  }
  0x61   : > { %443 = vperm.xlu1 %2094, %v378_v22  }
  0x64   : > { %600 = vperm.xlu0 %2091, %v379_v23  }
  0x65   : > { %446 = vperm.xlu1 %2094, %v379_v23  }
  0x68   : > { %2095 = vset.pattern.permute.xlu0 %v2192_v0 }
  0x8a   : > { %v387_v26 = vpop.permute.xlu1 %386  ;;  %v384_v27 = vpop.permute.xlu0 %383 }
  0x8b   : > { %vm449_vm0 = vcmp.eq.s32.totalorder %v387_v26, %v2287_v25  ;;  %vm448_vm1 = vcmp.eq.s32.totalorder %v384_v27, %v2287_v25 }
  0x8c   : > { %v1823_v31 = vsel %vm449_vm0, 1.0, %v2194_v30  ;;  %v1822_v32 = vsel %vm448_vm1, 1.0, %v2194_v30 }
  0x8f   : > { %v541_v28 = vpop.permute.xlu1 %540  ;;  %v538_v29 = vpop.permute.xlu0 %537 }
  0x90   : > { %vm603_vm2 = vcmp.eq.s32.totalorder %v541_v28, %v2287_v25  ;;  %vm602_vm3 = vcmp.eq.s32.totalorder %v538_v29, %v2287_v25 }
  0x91   : > { %v1845_v33 = vsel %vm603_vm2, 1.0, %v2194_v30  ;;  %v1844_v34 = vsel %vm602_vm3, 1.0, %v2194_v30 }
  0x92   : > { %v669_v36 = vadd.f32 %v1845_v33, %v1823_v31  ;;  %v668_v37 = vadd.f32 %v1844_v34, %v1822_v32 }
  0x93   : > { %v544_v39 = vpop.permute.xlu0 %543 }
  0x94   : > { %vm604_vm5 = vcmp.eq.s32.totalorder %v544_v39, %v2287_v25  ;;  %v390_v40 = vpop.permute.xlu1 %389  ;;  %v698_v41 = vmul.f32 %v2300_v35, %v669_v36  ;;  %v697_v42 = vmul.f32 %v2300_v35, %v668_v37  ;;  %v793_v44 = vmul.f32 %v2305_v38, %v668_v37 }
  0x95   : > { %v1846_v43 = vsel %vm604_vm5, 1.0, %v2194_v30  ;;  %vm450_vm6 = vcmp.eq.s32.totalorder %v390_v40, %v2287_v25  ;;  %v794_v48 = vmul.f32 %v2305_v38, %v669_v36 }
  0x96   : > { %v1824_v45 = vsel %vm450_vm6, 1.0, %v2194_v30  ;;  %v723_v46 = vsel %vm719_vm4, %v698_v41, 0.0  ;;  %v720_v47 = vsel %vm719_vm4, %v697_v42, 0.0  ;;  %v815_v54 = vsel %vm719_vm4, %v793_v44, 0.0 }
  0x97   : > { %v670_v49 = vadd.f32 %v1846_v43, %v1824_v45  ;;  %724 = vadd.xlane.f32.xlu0 %v723_v46  ;;  %721 = vadd.xlane.f32.xlu1 %v720_v47  ;;  %v547_v50 = vpop.permute.xlu0 %546  ;;  %v818_v55 = vsel %vm719_vm4, %v794_v48, 0.0 }
  0x98   : > { %vm605_vm7 = vcmp.eq.s32.totalorder %v547_v50, %v2287_v25  ;;  %v393_v51 = vpop.permute.xlu1 %392 }
  0x99   : > { %v1847_v52 = vsel %vm605_vm7, 1.0, %v2194_v30  ;;  %vm451_vm8 = vcmp.eq.s32.totalorder %v393_v51, %v2287_v25  ;;  %v699_v56 = vmul.f32 %v2300_v35, %v670_v49  ;;  %v795_v0 = vmul.f32 %v2305_v38, %v670_v49 }
  0x9a   : > { %v1825_v53 = vsel %vm451_vm8, 1.0, %v2194_v30 }
  0x9b   : > { %v671_v57 = vadd.f32 %v1847_v52, %v1825_v53  ;;  %816 = vadd.xlane.f32.xlu0 %v815_v54  ;;  %819 = vadd.xlane.f32.xlu1 %v818_v55  ;;  %v550_v58 = vpop.permute.xlu0 %549  ;;  %v726_v63 = vsel %vm719_vm4, %v699_v56, 0.0  ;;  %v821_v8 = vsel %vm719_vm4, %v795_v0, 0.0 }
  0x9c   : > { %vm606_vm9 = vcmp.eq.s32.totalorder %v550_v58, %v2287_v25  ;;  %v396_v59 = vpop.permute.xlu1 %395 }
  0x9d   : > { %v1848_v60 = vsel %vm606_vm9, 1.0, %v2194_v30  ;;  %vm452_vm10 = vcmp.eq.s32.totalorder %v396_v59, %v2287_v25  ;;  %v700_v61 = vmul.f32 %v2300_v35, %v671_v57  ;;  %v796_v4 = vmul.f32 %v2305_v38, %v671_v57 }
  0x9e   : > { %v1826_v62 = vsel %vm452_vm10, 1.0, %v2194_v30 }
  0x9f   : > { %v672_v1 = vadd.f32 %v1848_v60, %v1826_v62  ;;  %727 = vadd.xlane.f32.xlu0 %v726_v63  ;;  %v553_v2 = vpop.permute.xlu0 %552  ;;  %v729_v3 = vsel %vm719_vm4, %v700_v61, 0.0  ;;  %v824_v12 = vsel %vm719_vm4, %v796_v4, 0.0 }
  0xa0   : > { %vm607_vm11 = vcmp.eq.s32.totalorder %v553_v2, %v2287_v25  ;;  %v399_v5 = vpop.permute.xlu1 %398  ;;  %730 = vadd.xlane.f32.xlu1 %v729_v3 }
  0xa1   : > { %v1849_v6 = vsel %vm607_vm11, 1.0, %v2194_v30  ;;  %vm453_vm12 = vcmp.eq.s32.totalorder %v399_v5, %v2287_v25  ;;  %v701_v9 = vmul.f32 %v2300_v35, %v672_v1  ;;  %v797_v18 = vmul.f32 %v2305_v38, %v672_v1 }
  0xa2   : > { %v1827_v7 = vsel %vm453_vm12, 1.0, %v2194_v30 }
  0xa3   : > { %v673_v10 = vadd.f32 %v1849_v6, %v1827_v7  ;;  %822 = vadd.xlane.f32.xlu0 %v821_v8  ;;  %v556_v11 = vpop.permute.xlu0 %555  ;;  %v732_v17 = vsel %vm719_vm4, %v701_v9, 0.0  ;;  %v827_v27 = vsel %vm719_vm4, %v797_v18, 0.0 }
  0xa4   : > { %vm608_vm13 = vcmp.eq.s32.totalorder %v556_v11, %v2287_v25  ;;  %v402_v13 = vpop.permute.xlu1 %401  ;;  %825 = vadd.xlane.f32.xlu1 %v824_v12 }
  0xa5   : > { %v1850_v14 = vsel %vm608_vm13, 1.0, %v2194_v30  ;;  %vm454_vm14 = vcmp.eq.s32.totalorder %v402_v13, %v2287_v25  ;;  %v702_v15 = vmul.f32 %v2300_v35, %v673_v10  ;;  %v798_v22 = vmul.f32 %v2305_v38, %v673_v10 }
  0xa6   : > { %v1828_v16 = vsel %vm454_vm14, 1.0, %v2194_v30 }
  0xa7   : > { %v674_v19 = vadd.f32 %v1850_v14, %v1828_v16  ;;  %733 = vadd.xlane.f32.xlu0 %v732_v17  ;;  %v559_v20 = vpop.permute.xlu0 %558  ;;  %v735_v21 = vsel %vm719_vm4, %v702_v15, 0.0  ;;  %v830_v32 = vsel %vm719_vm4, %v798_v22, 0.0 }
  0xa8   : > { %vm609_vm15 = vcmp.eq.s32.totalorder %v559_v20, %v2287_v25  ;;  %v405_v23 = vpop.permute.xlu1 %404  ;;  %736 = vadd.xlane.f32.xlu1 %v735_v21 }
  0xa9   : > { %v1851_v24 = vsel %vm609_vm15, 1.0, %v2194_v30  ;;  %vm455_vm0 = vcmp.eq.s32.totalorder %v405_v23, %v2287_v25  ;;  %v703_v28 = vmul.f32 %v2300_v35, %v674_v19  ;;  %v799_v40 = vmul.f32 %v2305_v38, %v674_v19 }
  0xaa   : > { %v1829_v26 = vsel %vm455_vm0, 1.0, %v2194_v30 }
  0xab   : > { %v675_v29 = vadd.f32 %v1851_v24, %v1829_v26  ;;  %828 = vadd.xlane.f32.xlu0 %v827_v27  ;;  %v562_v31 = vpop.permute.xlu0 %561  ;;  %v738_v39 = vsel %vm719_vm4, %v703_v28, 0.0  ;;  %v833_v48 = vsel %vm719_vm4, %v799_v40, 0.0 }
  0xac   : > { %vm610_vm1 = vcmp.eq.s32.totalorder %v562_v31, %v2287_v25  ;;  %v408_v33 = vpop.permute.xlu1 %407  ;;  %831 = vadd.xlane.f32.xlu1 %v830_v32 }
  0xad   : > { %v1852_v34 = vsel %vm610_vm1, 1.0, %v2194_v30  ;;  %vm456_vm2 = vcmp.eq.s32.totalorder %v408_v33, %v2287_v25  ;;  %v704_v36 = vmul.f32 %v2300_v35, %v675_v29  ;;  %v800_v44 = vmul.f32 %v2305_v38, %v675_v29 }
  0xae   : > { %v1830_v37 = vsel %vm456_vm2, 1.0, %v2194_v30 }
  0xaf   : > { %v676_v41 = vadd.f32 %v1852_v34, %v1830_v37  ;;  %739 = vadd.xlane.f32.xlu0 %v738_v39  ;;  %v565_v42 = vpop.permute.xlu0 %564  ;;  %v741_v43 = vsel %vm719_vm4, %v704_v36, 0.0  ;;  %v836_v52 = vsel %vm719_vm4, %v800_v44, 0.0 }
  0xb0   : > { %vm611_vm3 = vcmp.eq.s32.totalorder %v565_v42, %v2287_v25  ;;  %v411_v45 = vpop.permute.xlu1 %410  ;;  %742 = vadd.xlane.f32.xlu1 %v741_v43 }
  0xb1   : > { %v1853_v46 = vsel %vm611_vm3, 1.0, %v2194_v30  ;;  %vm457_vm5 = vcmp.eq.s32.totalorder %v411_v45, %v2287_v25  ;;  %v705_v49 = vmul.f32 %v2300_v35, %v676_v41  ;;  %v801_v58 = vmul.f32 %v2305_v38, %v676_v41 }
  0xb2   : > { %v1831_v47 = vsel %vm457_vm5, 1.0, %v2194_v30 }
  0xb3   : > { %v677_v50 = vadd.f32 %v1853_v46, %v1831_v47  ;;  %834 = vadd.xlane.f32.xlu0 %v833_v48  ;;  %v568_v51 = vpop.permute.xlu0 %567  ;;  %v744_v57 = vsel %vm719_vm4, %v705_v49, 0.0  ;;  %v839_v2 = vsel %vm719_vm4, %v801_v58, 0.0 }
  0xb4   : > { %vm612_vm6 = vcmp.eq.s32.totalorder %v568_v51, %v2287_v25  ;;  %v414_v53 = vpop.permute.xlu1 %413  ;;  %837 = vadd.xlane.f32.xlu1 %v836_v52 }
  0xb5   : > { %v1854_v54 = vsel %vm612_vm6, 1.0, %v2194_v30  ;;  %vm458_vm7 = vcmp.eq.s32.totalorder %v414_v53, %v2287_v25  ;;  %v706_v55 = vmul.f32 %v2300_v35, %v677_v50  ;;  %v802_v62 = vmul.f32 %v2305_v38, %v677_v50 }
  0xb6   : > { %v1832_v56 = vsel %vm458_vm7, 1.0, %v2194_v30 }
  0xb7   : > { %v678_v59 = vadd.f32 %v1854_v54, %v1832_v56  ;;  %745 = vadd.xlane.f32.xlu0 %v744_v57  ;;  %v571_v60 = vpop.permute.xlu0 %570  ;;  %v747_v61 = vsel %vm719_vm4, %v706_v55, 0.0  ;;  %v842_v6 = vsel %vm719_vm4, %v802_v62, 0.0 }
  0xb8   : > { %vm613_vm8 = vcmp.eq.s32.totalorder %v571_v60, %v2287_v25  ;;  %v417_v63 = vpop.permute.xlu1 %416  ;;  %748 = vadd.xlane.f32.xlu1 %v747_v61 }
  0xb9   : > { %v1855_v0 = vsel %vm613_vm8, 1.0, %v2194_v30  ;;  %vm459_vm9 = vcmp.eq.s32.totalorder %v417_v63, %v2287_v25  ;;  %v707_v3 = vmul.f32 %v2300_v35, %v678_v59  ;;  %v803_v12 = vmul.f32 %v2305_v38, %v678_v59 }
  0xba   : > { %v1833_v1 = vsel %vm459_vm9, 1.0, %v2194_v30 }
  0xbb   : > { %v679_v4 = vadd.f32 %v1855_v0, %v1833_v1  ;;  %840 = vadd.xlane.f32.xlu0 %v839_v2  ;;  %v574_v5 = vpop.permute.xlu0 %573  ;;  %v750_v11 = vsel %vm719_vm4, %v707_v3, 0.0  ;;  %v845_v20 = vsel %vm719_vm4, %v803_v12, 0.0 }
  0xbc   : > { %vm614_vm10 = vcmp.eq.s32.totalorder %v574_v5, %v2287_v25  ;;  %v420_v7 = vpop.permute.xlu1 %419  ;;  %843 = vadd.xlane.f32.xlu1 %v842_v6 }
  0xbd   : > { %v1856_v8 = vsel %vm614_vm10, 1.0, %v2194_v30  ;;  %vm460_vm11 = vcmp.eq.s32.totalorder %v420_v7, %v2287_v25  ;;  %v708_v9 = vmul.f32 %v2300_v35, %v679_v4  ;;  %v804_v16 = vmul.f32 %v2305_v38, %v679_v4 }
  0xbe   : > { %v1834_v10 = vsel %vm460_vm11, 1.0, %v2194_v30 }
  0xbf   : > { %v680_v13 = vadd.f32 %v1856_v8, %v1834_v10  ;;  %751 = vadd.xlane.f32.xlu0 %v750_v11  ;;  %v577_v14 = vpop.permute.xlu0 %576  ;;  %v753_v15 = vsel %vm719_vm4, %v708_v9, 0.0  ;;  %v848_v24 = vsel %vm719_vm4, %v804_v16, 0.0 }
  0xc0   : > { %vm615_vm12 = vcmp.eq.s32.totalorder %v577_v14, %v2287_v25  ;;  %v423_v17 = vpop.permute.xlu1 %422  ;;  %754 = vadd.xlane.f32.xlu1 %v753_v15 }
  0xc1   : > { %v1857_v18 = vsel %vm615_vm12, 1.0, %v2194_v30  ;;  %vm461_vm13 = vcmp.eq.s32.totalorder %v423_v17, %v2287_v25  ;;  %v709_v21 = vmul.f32 %v2300_v35, %v680_v13  ;;  %v805_v32 = vmul.f32 %v2305_v38, %v680_v13 }
  0xc2   : > { %v1835_v19 = vsel %vm461_vm13, 1.0, %v2194_v30 }
  0xc3   : > { %v681_v22 = vadd.f32 %v1857_v18, %v1835_v19  ;;  %846 = vadd.xlane.f32.xlu0 %v845_v20  ;;  %v580_v23 = vpop.permute.xlu0 %579  ;;  %v756_v31 = vsel %vm719_vm4, %v709_v21, 0.0  ;;  %v851_v42 = vsel %vm719_vm4, %v805_v32, 0.0 }
  0xc4   : > { %vm616_vm14 = vcmp.eq.s32.totalorder %v580_v23, %v2287_v25  ;;  %v426_v26 = vpop.permute.xlu1 %425  ;;  %849 = vadd.xlane.f32.xlu1 %v848_v24 }
  0xc5   : > { %v1858_v27 = vsel %vm616_vm14, 1.0, %v2194_v30  ;;  %vm462_vm15 = vcmp.eq.s32.totalorder %v426_v26, %v2287_v25  ;;  %v710_v28 = vmul.f32 %v2300_v35, %v681_v22  ;;  %v806_v37 = vmul.f32 %v2305_v38, %v681_v22 }
  0xc6   : > { %v1836_v29 = vsel %vm462_vm15, 1.0, %v2194_v30 }
  0xc7   : > { %v682_v33 = vadd.f32 %v1858_v27, %v1836_v29  ;;  %757 = vadd.xlane.f32.xlu0 %v756_v31  ;;  %v583_v34 = vpop.permute.xlu0 %582  ;;  %v759_v36 = vsel %vm719_vm4, %v710_v28, 0.0  ;;  %v854_v46 = vsel %vm719_vm4, %v806_v37, 0.0 }
  0xc8   : > { %vm617_vm0 = vcmp.eq.s32.totalorder %v583_v34, %v2287_v25  ;;  %v429_v39 = vpop.permute.xlu1 %428  ;;  %760 = vadd.xlane.f32.xlu1 %v759_v36 }
  0xc9   : > { %v1859_v40 = vsel %vm617_vm0, 1.0, %v2194_v30  ;;  %vm463_vm1 = vcmp.eq.s32.totalorder %v429_v39, %v2287_v25  ;;  %v711_v43 = vmul.f32 %v2300_v35, %v682_v33  ;;  %v807_v52 = vmul.f32 %v2305_v38, %v682_v33 }
  0xca   : > { %v1837_v41 = vsel %vm463_vm1, 1.0, %v2194_v30 }
  0xcb   : > { %v683_v44 = vadd.f32 %v1859_v40, %v1837_v41  ;;  %852 = vadd.xlane.f32.xlu0 %v851_v42  ;;  %v586_v45 = vpop.permute.xlu0 %585  ;;  %v762_v51 = vsel %vm719_vm4, %v711_v43, 0.0  ;;  %v857_v60 = vsel %vm719_vm4, %v807_v52, 0.0 }
  0xcc   : > { %vm618_vm2 = vcmp.eq.s32.totalorder %v586_v45, %v2287_v25  ;;  %v432_v47 = vpop.permute.xlu1 %431  ;;  %855 = vadd.xlane.f32.xlu1 %v854_v46  ;;  %v1232_v45 = vld [vmem:[%s2716_s5 + $0x70] sm:$0xff] }
  0xcd   : > { %v1860_v48 = vsel %vm618_vm2, 1.0, %v2194_v30  ;;  %vm464_vm3 = vcmp.eq.s32.totalorder %v432_v47, %v2287_v25  ;;  %v712_v49 = vmul.f32 %v2300_v35, %v683_v44  ;;  %v808_v56 = vmul.f32 %v2305_v38, %v683_v44  ;;  %v881_v47 = vld [vmem:[%s2488_s28] sm:$0xff] }
  0xce   : > { %v1838_v50 = vsel %vm464_vm3, 1.0, %v2194_v30 }
  0xcf   : > { %v684_v53 = vadd.f32 %v1860_v48, %v1838_v50  ;;  %763 = vadd.xlane.f32.xlu0 %v762_v51  ;;  %v589_v54 = vpop.permute.xlu0 %588  ;;  %v765_v55 = vsel %vm719_vm4, %v712_v49, 0.0  ;;  %v860_v0 = vsel %vm719_vm4, %v808_v56, 0.0  ;;  %v882_v49 = vld [vmem:[%s2488_s28 + $0x8] sm:$0xff] }
  0xd0   : > { %vm619_vm5 = vcmp.eq.s32.totalorder %v589_v54, %v2287_v25  ;;  %v435_v57 = vpop.permute.xlu1 %434  ;;  %766 = vadd.xlane.f32.xlu1 %v765_v55  ;;  %v1230_v54 = vld [vmem:[%s2716_s5 + $0x60] sm:$0xff] }
  0xd1   : > { %v1861_v58 = vsel %vm619_vm5, 1.0, %v2194_v30  ;;  %vm465_vm6 = vcmp.eq.s32.totalorder %v435_v57, %v2287_v25  ;;  %v713_v61 = vmul.f32 %v2300_v35, %v684_v53  ;;  %v809_v6 = vmul.f32 %v2305_v38, %v684_v53  ;;  %v1229_v57 = vld [vmem:[%s2716_s5 + $0x58] sm:$0xff] }
  0xd2   : > { %v1839_v59 = vsel %vm465_vm6, 1.0, %v2194_v30 }
  0xd3   : > { %v685_v62 = vadd.f32 %v1861_v58, %v1839_v59  ;;  %858 = vadd.xlane.f32.xlu0 %v857_v60  ;;  %v592_v63 = vpop.permute.xlu0 %591  ;;  %v768_v5 = vsel %vm719_vm4, %v713_v61, 0.0  ;;  %v863_v14 = vsel %vm719_vm4, %v809_v6, 0.0  ;;  %v883_v59 = vld [vmem:[%s2488_s28 + $0x10] sm:$0xff] }
  0xd4   : > { %vm620_vm7 = vcmp.eq.s32.totalorder %v592_v63, %v2287_v25  ;;  %v438_v1 = vpop.permute.xlu1 %437  ;;  %861 = vadd.xlane.f32.xlu1 %v860_v0  ;;  %v1228_v60 = vld [vmem:[%s2716_s5 + $0x50] sm:$0xff]  ;;  %v884_v0 = vld [vmem:[%s2488_s28 + $0x18] sm:$0xff] }
  0xd5   : > { %v1862_v2 = vsel %vm620_vm7, 1.0, %v2194_v30  ;;  %vm466_vm8 = vcmp.eq.s32.totalorder %v438_v1, %v2287_v25  ;;  %v714_v3 = vmul.f32 %v2300_v35, %v685_v62  ;;  %v810_v10 = vmul.f32 %v2305_v38, %v685_v62  ;;  %v1227_v62 = vld [vmem:[%s2716_s5 + $0x48] sm:$0xff] }
  0xd6   : > { %v1840_v4 = vsel %vm466_vm8, 1.0, %v2194_v30 }
  0xd7   : > { %v686_v7 = vadd.f32 %v1862_v2, %v1840_v4  ;;  %769 = vadd.xlane.f32.xlu0 %v768_v5  ;;  %v595_v8 = vpop.permute.xlu0 %594  ;;  %v771_v9 = vsel %vm719_vm4, %v714_v3, 0.0  ;;  %v866_v18 = vsel %vm719_vm4, %v810_v10, 0.0  ;;  %v1226_v2 = vld [vmem:[%s2716_s5 + $0x40] sm:$0xff]  ;;  %v1225_v5 = vld [vmem:[%s2716_s5 + $0x38] sm:$0xff] }
  0xd8   : > { %vm621_vm9 = vcmp.eq.s32.totalorder %v595_v8, %v2287_v25  ;;  %v441_v11 = vpop.permute.xlu1 %440  ;;  %772 = vadd.xlane.f32.xlu1 %v771_v9  ;;  %v885_v8 = vld [vmem:[%s2488_s28 + $0x20] sm:$0xff]  ;;  %v1224_v9 = vld [vmem:[%s2716_s5 + $0x30] sm:$0xff] }
  0xd9   : > { %v1863_v12 = vsel %vm621_vm9, 1.0, %v2194_v30  ;;  %vm467_vm10 = vcmp.eq.s32.totalorder %v441_v11, %v2287_v25  ;;  %v715_v15 = vmul.f32 %v2300_v35, %v686_v7  ;;  %v811_v24 = vmul.f32 %v2305_v38, %v686_v7 }
  0xda   : > { %v1841_v13 = vsel %vm467_vm10, 1.0, %v2194_v30 }
  0xdb   : > { %v687_v16 = vadd.f32 %v1863_v12, %v1841_v13  ;;  %864 = vadd.xlane.f32.xlu0 %v863_v14  ;;  %v598_v17 = vpop.permute.xlu0 %597  ;;  %v774_v23 = vsel %vm719_vm4, %v715_v15, 0.0  ;;  %v869_v34 = vsel %vm719_vm4, %v811_v24, 0.0  ;;  %v1223_v12 = vld [vmem:[%s2716_s5 + $0x28] sm:$0xff] }
  0xdc   : > { %vm622_vm11 = vcmp.eq.s32.totalorder %v598_v17, %v2287_v25  ;;  %v444_v19 = vpop.permute.xlu1 %443  ;;  %867 = vadd.xlane.f32.xlu1 %v866_v18  ;;  %v886_v14 = vld [vmem:[%s2488_s28 + $0x28] sm:$0xff] }
  0xdd   : > { %v1864_v20 = vsel %vm622_vm11, 1.0, %v2194_v30  ;;  %vm468_vm12 = vcmp.eq.s32.totalorder %v444_v19, %v2287_v25  ;;  %v716_v21 = vmul.f32 %v2300_v35, %v687_v16  ;;  %v812_v29 = vmul.f32 %v2305_v38, %v687_v16  ;;  %v1222_v16 = vld [vmem:[%s2716_s5 + $0x20] sm:$0xff]  ;;  %v1221_v19 = vld [vmem:[%s2716_s5 + $0x18] sm:$0xff] }
  0xde   : > { %v1842_v22 = vsel %vm468_vm12, 1.0, %v2194_v30 }
  0xdf   : > { %v688_v26 = vadd.f32 %v1864_v20, %v1842_v22  ;;  %775 = vadd.xlane.f32.xlu0 %v774_v23  ;;  %v601_v27 = vpop.permute.xlu0 %600  ;;  %v777_v28 = vsel %vm719_vm4, %v716_v21, 0.0  ;;  %v872_v39 = vsel %vm719_vm4, %v812_v29, 0.0  ;;  %v887_v22 = vld [vmem:[%s2488_s28 + $0x30] sm:$0xff]  ;;  %v888_v29 = vld [vmem:[%s2488_s28 + $0x38] sm:$0xff] }
  0xe0   : > { %vm623_vm13 = vcmp.eq.s32.totalorder %v601_v27, %v2287_v25  ;;  %v447_v31 = vpop.permute.xlu1 %446  ;;  %778 = vadd.xlane.f32.xlu1 %v777_v28  ;;  %v1220_v23 = vld [vmem:[%s2716_s5 + $0x10] sm:$0xff]  ;;  %v1219_v27 = vld [vmem:[%s2716_s5 + $0x8] sm:$0xff] }
  0xe1   : > { %v1865_v32 = vsel %vm623_vm13, 1.0, %v2194_v30  ;;  %vm469_vm14 = vcmp.eq.s32.totalorder %v447_v31, %v2287_v25  ;;  %v717_v36 = vmul.f32 %v2300_v35, %v688_v26  ;;  %v813_v42 = vmul.f32 %v2305_v38, %v688_v26 }
  0xe2   : > { %v1843_v33 = vsel %vm469_vm14, 1.0, %v2194_v30 }
  0xe3   : > { %v689_v37 = vadd.f32 %v1865_v32, %v1843_v33  ;;  %870 = vadd.xlane.f32.xlu0 %v869_v34  ;;  %v780_v41 = vsel %vm719_vm4, %v717_v36, 0.0  ;;  %v875_v43 = vsel %vm719_vm4, %v813_v42, 0.0  ;;  %v1218_v32 = vld [vmem:[%s2716_s5] sm:$0xff]  ;;  %v890_v42 = vld [vmem:[%s2488_s28 + $0x48] sm:$0xff] }
  0xe4   : > { %873 = vadd.xlane.f32.xlu1 %v872_v39  ;;  %v889_v39 = vld [vmem:[%s2488_s28 + $0x40] sm:$0xff] }
  0xe5   : > { %v718_v40 = vmul.f32 %v2300_v35, %v689_v37  ;;  %v814_v30 = vmul.f32 %v2305_v38, %v689_v37  ;;  %v1233_v35 = vld [vmem:[%s2716_s5 + $0x78] sm:$0xff]  ;;  %v1231_v38 = vld [vmem:[%s2716_s5 + $0x68] sm:$0xff] }
  0xe6   : > { %1949 = vmatprep.subr.mxu0 %v1233_v35 }
  0xe7   : > { %781 = vadd.xlane.f32.xlu0 %v780_v41  ;;  %v783_v25 = vsel %vm719_vm4, %v718_v40, 0.0  ;;  %v878_v44 = vsel %vm719_vm4, %v814_v30, 0.0  ;;  %1950 = vmatpush3.msra.mxu0 %v1233_v35 }
  0xe8   : > { %784 = vadd.xlane.f32.xlu1 %v783_v25  ;;  %1951 = vmatprep.subr.mxu0 %v1232_v45 }
  0xe9   : > { %1952 = vmatpush3.msra.mxu0 %v1232_v45 }
  0xea   : > { %1953 = vmatprep.subr.mxu0 %v1231_v38 }
  0xeb   : > { %876 = vadd.xlane.f32.xlu0 %v875_v43  ;;  %1954 = vmatpush3.msra.mxu0 %v1231_v38 }
  0xec   : > { %879 = vadd.xlane.f32.xlu1 %v878_v44  ;;  %1955 = vmatprep.subr.mxu0 %v1230_v54 }
  0xed   : > { %1956 = vmatpush3.msra.mxu0 %v1230_v54 }
  0xee   : > { %1957 = vmatprep.subr.mxu0 %v1229_v57 }
  0xef   : > { %1958 = vmatpush3.msra.mxu0 %v1229_v57 }
  0xf0   : > { %1959 = vmatprep.subr.mxu0 %v1228_v60 }
  0xf1   : > { %1960 = vmatpush3.msra.mxu0 %v1228_v60 }
  0xf2   : > { %1961 = vmatprep.subr.mxu0 %v1227_v62 }
  0xf3   : > { %1962 = vmatpush3.msra.mxu0 %v1227_v62 }
  0xf4   : > { %1963 = vmatprep.subr.mxu0 %v1226_v2 }
  0xf5   : > { %1964 = vmatpush3.msra.mxu0 %v1226_v2  ;;  %v895_v2 = vld [vmem:[%s2488_s28 + $0x70] sm:$0xff] }
  0xf6   : > { %1965 = vmatprep.subr.mxu0 %v1225_v5 }
  0xf7   : > { %1966 = vmatpush3.msra.mxu0 %v1225_v5 }
  0xf8   : > { %1967 = vmatprep.subr.mxu0 %v1224_v9 }
  0xf9   : > { %1968 = vmatpush3.msra.mxu0 %v1224_v9 }
  0xfa   : > { %1969 = vmatprep.subr.mxu0 %v1223_v12 }
  0xfb   : > { %1970 = vmatpush3.msra.mxu0 %v1223_v12  ;;  %v897_v12 = vld [vmem:[%s2488_s28 + $0x80] sm:$0xff] }
  0xfc   : > { %1971 = vmatprep.subr.mxu0 %v1222_v16 }
  0xfd   : > { %1972 = vmatpush3.msra.mxu0 %v1222_v16 }
  0xfe   : > { %1973 = vmatprep.subr.mxu0 %v1221_v19 }
  0xff   : > { %1974 = vmatpush3.msra.mxu0 %v1221_v19 }
 0x100   : > { %1975 = vmatprep.subr.mxu0 %v1220_v23 }
 0x101   : > { %1976 = vmatpush3.msra.mxu0 %v1220_v23 }
 0x102   : > { %1977 = vmatprep.subr.mxu0 %v1219_v27 }
 0x103   : > { %1978 = vmatpush3.msra.mxu0 %v1219_v27 }
 0x104   : > { %1979 = vmatprep.subr.mxu0 %v1218_v32 }
 0x105   : > { %1980 = vmatpush3.msra.mxu0 %v1218_v32 }
 0x120   : > { %v722_v46 = vpop.xlane.xlu1 %721  ;;  %v725_v48 = vpop.xlane.xlu0 %724 }
 0x121   : > { %v903_v50 = vmul.f32 %v881_v47, %v722_v46  ;;  %v904_v51 = vmul.f32 %v882_v49, %v725_v48  ;;  %v891_v46 = vld [vmem:[%s2488_s28 + $0x50] sm:$0xff]  ;;  %v892_v48 = vld [vmem:[%s2488_s28 + $0x58] sm:$0xff] }
 0x124   : > { %v820_v52 = vpop.xlane.xlu1 %819  ;;  %v817_v53 = vpop.xlane.xlu0 %816 }
 0x125   : > { %v926_v55 = vadd.f32 %v904_v51, %v820_v52  ;;  %v925_v56 = vadd.f32 %v903_v50, %v817_v53 }
 0x127   : > { %955 = vperm.xlu1 %2094, %v926_v55   ;;  %950 = vperm.xlu0 %2095, %v925_v56   ;;  %v893_v56 = vld [vmem:[%s2488_s28 + $0x60] sm:$0xff] }
 0x128   : > { %v728_v58 = vpop.xlane.xlu0 %727 }
 0x129   : > { %v731_v61 = vpop.xlane.xlu1 %730  ;;  %v905_v63 = vmul.f32 %v883_v59, %v728_v58  ;;  %v894_v58 = vld [vmem:[%s2488_s28 + $0x68] sm:$0xff] }
 0x12a   : > { %v906_v6 = vmul.f32 %v884_v0, %v731_v61 }
 0x12c   : > { %v823_v1 = vpop.xlane.xlu0 %822 }
 0x12d   : > { %v927_v3 = vadd.f32 %v905_v63, %v823_v1  ;;  %v826_v4 = vpop.xlane.xlu1 %825 }
 0x12e   : > { %v928_v10 = vadd.f32 %v906_v6, %v826_v4  ;;  %v896_v4 = vld [vmem:[%s2488_s28 + $0x78] sm:$0xff] }
 0x12f   : > { %960 = vperm.xlu1 %2094, %v927_v3  }
 0x130   : > { %v734_v7 = vpop.xlane.xlu0 %733 }
 0x131   : > { %v737_v11 = vpop.xlane.xlu1 %736  ;;  %v907_v13 = vmul.f32 %v885_v8, %v734_v7 }
 0x132   : > { %v908_v20 = vmul.f32 %v886_v14, %v737_v11  ;;  %v898_v14 = vld [vmem:[%s2488_s28 + $0x88] sm:$0xff] }
 0x133   : > { %965 = vperm.xlu1 %2094, %v928_v10  }
 0x134   : > { %v829_v15 = vpop.xlane.xlu0 %828 }
 0x135   : > { %v929_v17 = vadd.f32 %v907_v13, %v829_v15  ;;  %v832_v18 = vpop.xlane.xlu1 %831 }
 0x136   : > { %v930_v24 = vadd.f32 %v908_v20, %v832_v18 }
 0x137   : > { %970 = vperm.xlu1 %2094, %v929_v17  }
 0x138   : > { %v740_v21 = vpop.xlane.xlu0 %739 }
 0x139   : > { %v743_v26 = vpop.xlane.xlu1 %742  ;;  %v909_v28 = vmul.f32 %v887_v22, %v740_v21  ;;  %v899_v22 = vld [vmem:[%s2488_s28 + $0x90] sm:$0xff] }
 0x13a   : > { %v910_v36 = vmul.f32 %v888_v29, %v743_v26 }
 0x13b   : > { %975 = vperm.xlu1 %2094, %v930_v24   ;;  %v900_v24 = vld [vmem:[%s2488_s28 + $0x98] sm:$0xff] }
 0x13c   : > { %v835_v31 = vpop.xlane.xlu0 %834 }
 0x13d   : > { %v931_v33 = vadd.f32 %v909_v28, %v835_v31  ;;  %v838_v34 = vpop.xlane.xlu1 %837 }
 0x13e   : > { %v932_v40 = vadd.f32 %v910_v36, %v838_v34  ;;  %v901_v34 = vld [vmem:[%s2488_s28 + $0xa0] sm:$0xff] }
 0x13f   : > { %980 = vperm.xlu1 %2094, %v931_v33  }
 0x140   : > { %v746_v37 = vpop.xlane.xlu0 %745 }
 0x141   : > { %v749_v41 = vpop.xlane.xlu1 %748  ;;  %v911_v25 = vmul.f32 %v889_v39, %v746_v37  ;;  %v902_v37 = vld [vmem:[%s2488_s28 + $0xa8] sm:$0xff] }
 0x142   : > { %v912_v30 = vmul.f32 %v890_v42, %v749_v41 }
 0x143   : > { %985 = vperm.xlu1 %2094, %v932_v40  }
 0x144   : > { %v841_v43 = vpop.xlane.xlu0 %840 }
 0x145   : > { %v933_v44 = vadd.f32 %v911_v25, %v841_v43  ;;  %v844_v35 = vpop.xlane.xlu1 %843  ;;  %v1541_v43 = vld [vmem:[%s2718_s7 + $0x78] sm:$0xff] }
 0x146   : > { %v934_v45 = vadd.f32 %v912_v30, %v844_v35  ;;  %2014 = vmatprep.subr.mxu1 %v1541_v43  ;;  %v1539_v35 = vld [vmem:[%s2718_s7 + $0x68] sm:$0xff] }
 0x147   : > { %990 = vperm.xlu1 %2094, %v933_v44   ;;  %v1540_v44 = vld [vmem:[%s2718_s7 + $0x70] sm:$0xff]  ;;  %2015 = vmatpush3.msra.mxu1 %v1541_v43 }
 0x148   : > { %v752_v38 = vpop.xlane.xlu0 %751  ;;  %995 = vperm.xlu0 %2095, %v934_v45   ;;  %2016 = vmatprep.subr.mxu1 %v1540_v44  ;;  %v2563_v45 = vld [vmem:[%s2715_s4] ss:$0 sm:$0xff] }
 0x149   : > { %v755_v47 = vpop.xlane.xlu1 %754  ;;  %v913_v49 = vmul.f32 %v891_v46, %v752_v38  ;;  %2017 = vmatpush3.msra.mxu1 %v1540_v44 }
 0x14a   : > { %v914_v50 = vmul.f32 %v892_v48, %v755_v47  ;;  %2018 = vmatprep.subr.mxu1 %v1539_v35 }
 0x14b   : > { %2019 = vmatpush3.msra.mxu1 %v1539_v35 }
 0x14c   : > { %v847_v51 = vpop.xlane.xlu0 %846 }
 0x14d   : > { %v935_v52 = vadd.f32 %v913_v49, %v847_v51  ;;  %v850_v53 = vpop.xlane.xlu1 %849 }
 0x14e   : > { %v936_v54 = vadd.f32 %v914_v50, %v850_v53 }
 0x14f   : > { %1000 = vperm.xlu1 %2094, %v935_v52  }
 0x150   : > { %v758_v55 = vpop.xlane.xlu0 %757  ;;  %1005 = vperm.xlu0 %2095, %v936_v54  }
 0x151   : > { %v761_v57 = vpop.xlane.xlu1 %760  ;;  %v915_v59 = vmul.f32 %v893_v56, %v758_v55 }
 0x152   : > { %v916_v60 = vmul.f32 %v894_v58, %v761_v57 }
 0x154   : > { %v853_v61 = vpop.xlane.xlu0 %852 }
 0x155   : > { %v937_v62 = vadd.f32 %v915_v59, %v853_v61  ;;  %v856_v63 = vpop.xlane.xlu1 %855 }
 0x156   : > { %v938_v0 = vadd.f32 %v916_v60, %v856_v63 }
 0x157   : > { %1010 = vperm.xlu1 %2094, %v937_v62  }
 0x158   : > { %v764_v1 = vpop.xlane.xlu0 %763  ;;  %1015 = vperm.xlu0 %2095, %v938_v0  }
 0x159   : > { %v767_v3 = vpop.xlane.xlu1 %766  ;;  %v917_v5 = vmul.f32 %v895_v2, %v764_v1 }
 0x15a   : > { %v918_v6 = vmul.f32 %v896_v4, %v767_v3 }
 0x15c   : > { %v859_v7 = vpop.xlane.xlu0 %858 }
 0x15d   : > { %v939_v8 = vadd.f32 %v917_v5, %v859_v7  ;;  %v862_v9 = vpop.xlane.xlu1 %861 }
 0x15e   : > { %v940_v10 = vadd.f32 %v918_v6, %v862_v9 }
 0x15f   : > { %1020 = vperm.xlu1 %2094, %v939_v8  }
 0x160   : > { %v770_v11 = vpop.xlane.xlu0 %769  ;;  %1025 = vperm.xlu0 %2095, %v940_v10  }
 0x161   : > { %v773_v13 = vpop.xlane.xlu1 %772  ;;  %v919_v15 = vmul.f32 %v897_v12, %v770_v11 }
 0x162   : > { %v920_v16 = vmul.f32 %v898_v14, %v773_v13 }
 0x164   : > { %v865_v17 = vpop.xlane.xlu0 %864 }
 0x165   : > { %v941_v18 = vadd.f32 %v919_v15, %v865_v17  ;;  %v868_v19 = vpop.xlane.xlu1 %867 }
 0x166   : > { %v942_v20 = vadd.f32 %v920_v16, %v868_v19 }
 0x167   : > { %1030 = vperm.xlu1 %2094, %v941_v18  }
 0x168   : > { %v776_v21 = vpop.xlane.xlu0 %775  ;;  %1035 = vperm.xlu0 %2095, %v942_v20  }
 0x169   : > { %v779_v23 = vpop.xlane.xlu1 %778  ;;  %v921_v26 = vmul.f32 %v899_v22, %v776_v21 }
 0x16a   : > { %v922_v27 = vmul.f32 %v900_v24, %v779_v23 }
 0x16c   : > { %v871_v28 = vpop.xlane.xlu0 %870 }
 0x16d   : > { %v943_v29 = vadd.f32 %v921_v26, %v871_v28  ;;  %v874_v31 = vpop.xlane.xlu1 %873 }
 0x16e   : > { %v944_v32 = vadd.f32 %v922_v27, %v874_v31 }
 0x16f   : > { %1040 = vperm.xlu1 %2094, %v943_v29  }
 0x170   : > { %v782_v33 = vpop.xlane.xlu0 %781  ;;  %1045 = vperm.xlu0 %2095, %v944_v32  }
 0x171   : > { %v785_v36 = vpop.xlane.xlu1 %784  ;;  %v923_v39 = vmul.f32 %v901_v34, %v782_v33 }
 0x172   : > { %v924_v40 = vmul.f32 %v902_v37, %v785_v36 }
 0x174   : > { %v877_v41 = vpop.xlane.xlu0 %876 }
 0x175   : > { %v945_v42 = vadd.f32 %v923_v39, %v877_v41  ;;  %v880_v25 = vpop.xlane.xlu1 %879 }
 0x176   : > { %v946_v30 = vadd.f32 %v924_v40, %v880_v25 }
 0x177   : > { %1050 = vperm.xlu1 %2094, %v945_v42  }
 0x178   : > { %1055 = vperm.xlu0 %2095, %v946_v30  }
 0x1a2   : > { %v956_v38 = vpop.permute.xlu1 %955  ;;  %v951_v46 = vpop.permute.xlu0 %950 }
 0x1a3   : > { %v1065_v47 = vsub.f32 %v956_v38, %v2563_v45  ;;  %v1064_v48 = vsub.f32 %v951_v46, %v2563_v45 }
 0x1a5   : > { %v1087_v49 = vmul.f32 14.111111, %v1065_v47  ;;  %v1086_v50 = vmul.f32 14.111111, %v1064_v48 }
 0x1a7   : > { %v1109_v51 = vmul.f32 %v1087_v49, %v1087_v49  ;;  %v1108_v52 = vmul.f32 %v1086_v50, %v1086_v50 }
 0x1a9   : > { %v1131_v53 = vmul.f32 -0.5, %v1109_v51  ;;  %v1130_v54 = vmul.f32 -0.5, %v1108_v52 }
 0x1aa   : > { %v961_v55 = vpop.permute.xlu1 %960 }
 0x1ab   : > { %v1154_v56 = vmul.f32 1.442695, %v1131_v53  ;;  %v1152_v57 = vmul.f32 1.442695, %v1130_v54  ;;  %v1066_v58 = vsub.f32 %v961_v55, %v2563_v45 }
 0x1ad   : > { %2096 = vpow2.f32 %v1154_v56  ;;  %v1088_v59 = vmul.f32 14.111111, %v1066_v58 }
 0x1ae   : > { %2098 = vpow2.f32 %v1152_v57  ;;  %v966_v60 = vpop.permute.xlu1 %965 }
 0x1af   : > { %v1110_v61 = vmul.f32 %v1088_v59, %v1088_v59  ;;  %v1067_v62 = vsub.f32 %v966_v60, %v2563_v45 }
 0x1b1   : > { %v1132_v63 = vmul.f32 -0.5, %v1110_v61  ;;  %v1089_v0 = vmul.f32 14.111111, %v1067_v62 }
 0x1b2   : > { %v971_v1 = vpop.permute.xlu1 %970 }
 0x1b3   : > { %v1156_v2 = vmul.f32 1.442695, %v1132_v63  ;;  %v1111_v3 = vmul.f32 %v1089_v0, %v1089_v0  ;;  %v1068_v4 = vsub.f32 %v971_v1, %v2563_v45 }
 0x1b5   : > { %2100 = vpow2.f32 %v1156_v2  ;;  %v1133_v5 = vmul.f32 -0.5, %v1111_v3  ;;  %v1090_v6 = vmul.f32 14.111111, %v1068_v4 }
 0x1b6   : > { %v976_v7 = vpop.permute.xlu1 %975 }
 0x1b7   : > { %v1158_v8 = vmul.f32 1.442695, %v1133_v5  ;;  %v1112_v9 = vmul.f32 %v1090_v6, %v1090_v6  ;;  %v1069_v10 = vsub.f32 %v976_v7, %v2563_v45 }
 0x1b9   : > { %2102 = vpow2.f32 %v1158_v8  ;;  %v1134_v11 = vmul.f32 -0.5, %v1112_v9  ;;  %v1091_v12 = vmul.f32 14.111111, %v1069_v10 }
 0x1ba   : > { %v2097_v13 = vpop.eup %2096  ;;  %v981_v14 = vpop.permute.xlu1 %980 }
 0x1bb   : > { %v2099_v15 = vpop.eup %2098  ;;  %v1160_v16 = vmul.f32 1.442695, %v1134_v11  ;;  %v1113_v17 = vmul.f32 %v1091_v12, %v1091_v12  ;;  %v1070_v18 = vsub.f32 %v981_v14, %v2563_v45  ;;  %v1197_v19 = vmul.f32 5.6295214, %v2097_v13 }
 0x1bc   : > { %v1196_v20 = vmul.f32 5.6295214, %v2099_v15 }
 0x1bd   : > { %2104 = vpow2.f32 %v1160_v16  ;;  %v1135_v21 = vmul.f32 -0.5, %v1113_v17  ;;  %v1092_v22 = vmul.f32 14.111111, %v1070_v18 }
 0x1be   : > { %1981 = vmatprep.mubr.f32.mxu0 %v1196_v20  ;;  %v986_v23 = vpop.permute.xlu1 %985 }
 0x1bf   : > { %v1162_v24 = vmul.f32 1.442695, %v1135_v21  ;;  %v1114_v26 = vmul.f32 %v1092_v22, %v1092_v22  ;;  %v1071_v27 = vsub.f32 %v986_v23, %v2563_v45  ;;  %1982 = vmatmul.mubr.f32.vlgmr.msra.gmra.mxu0 %v1197_v19 }
 0x1c1   : > { %2106 = vpow2.f32 %v1162_v24  ;;  %v1136_v28 = vmul.f32 -0.5, %v1114_v26  ;;  %v1093_v29 = vmul.f32 14.111111, %v1071_v27 }
 0x1c2   : > { %v2101_v31 = vpop.eup %2100  ;;  %v991_v32 = vpop.permute.xlu1 %990 }
 0x1c3   : > { %v1164_v33 = vmul.f32 1.442695, %v1136_v28  ;;  %v1115_v34 = vmul.f32 %v1093_v29, %v1093_v29  ;;  %v1072_v36 = vsub.f32 %v991_v32, %v2563_v45  ;;  %v996_v37 = vpop.permute.xlu0 %995  ;;  %v1198_v39 = vmul.f32 5.6295214, %v2101_v31 }
 0x1c4   : > { %v1073_v40 = vsub.f32 %v996_v37, %v2563_v45 }
 0x1c5   : > { %2108 = vpow2.f32 %v1164_v33  ;;  %v1137_v41 = vmul.f32 -0.5, %v1115_v34  ;;  %v1094_v42 = vmul.f32 14.111111, %v1072_v36  ;;  %1984 = vmatprep.mubr.f32.mxu0 %v1198_v39 }
 0x1c6   : > { %v2103_v25 = vpop.eup %2102  ;;  %v1095_v30 = vmul.f32 14.111111, %v1073_v40 }
 0x1c7   : > { %v1166_v43 = vmul.f32 1.442695, %v1137_v41  ;;  %v1116_v44 = vmul.f32 %v1094_v42, %v1094_v42  ;;  %v1199_v35 = vmul.f32 5.6295214, %v2103_v25 }
 0x1c8   : > { %v1117_v38 = vmul.f32 %v1095_v30, %v1095_v30 }
 0x1c9   : > { %2110 = vpow2.f32 %v1166_v43  ;;  %v1138_v46 = vmul.f32 -0.5, %v1116_v44  ;;  %1985 = vmatmul.mubr.f32.gmra.mxu0 %v1199_v35 }
 0x1ca   : > { %v2105_v47 = vpop.eup %2104  ;;  %v1139_v48 = vmul.f32 -0.5, %v1117_v38  ;;  %v1001_v49 = vpop.permute.xlu1 %1000 }
 0x1cb   : > { %v1168_v50 = vmul.f32 1.442695, %v1138_v46  ;;  %v1074_v51 = vsub.f32 %v1001_v49, %v2563_v45  ;;  %v1006_v52 = vpop.permute.xlu0 %1005  ;;  %v1200_v53 = vmul.f32 5.6295214, %v2105_v47 }
 0x1cc   : > { %v1170_v54 = vmul.f32 1.442695, %v1139_v48  ;;  %v1075_v55 = vsub.f32 %v1006_v52, %v2563_v45 }
 0x1cd   : > { %2112 = vpow2.f32 %v1168_v50  ;;  %v1096_v56 = vmul.f32 14.111111, %v1074_v51  ;;  %1987 = vmatprep.mubr.f32.mxu0 %v1200_v53 }
 0x1ce   : > { %v2107_v57 = vpop.eup %2106  ;;  %2114 = vpow2.f32 %v1170_v54  ;;  %v1097_v58 = vmul.f32 14.111111, %v1075_v55 }
 0x1cf   : > { %v1118_v59 = vmul.f32 %v1096_v56, %v1096_v56  ;;  %v1201_v60 = vmul.f32 5.6295214, %v2107_v57 }
 0x1d0   : > { %v1119_v61 = vmul.f32 %v1097_v58, %v1097_v58 }
 0x1d1   : > { %v1140_v62 = vmul.f32 -0.5, %v1118_v59  ;;  %1988 = vmatmul.mubr.f32.gmra.mxu0 %v1201_v60 }
 0x1d2   : > { %v2109_v63 = vpop.eup %2108  ;;  %v1141_v0 = vmul.f32 -0.5, %v1119_v61  ;;  %v1011_v1 = vpop.permute.xlu1 %1010 }
 0x1d3   : > { %v1172_v2 = vmul.f32 1.442695, %v1140_v62  ;;  %v1076_v3 = vsub.f32 %v1011_v1, %v2563_v45  ;;  %v1016_v4 = vpop.permute.xlu0 %1015  ;;  %v1202_v5 = vmul.f32 5.6295214, %v2109_v63 }
 0x1d4   : > { %v1174_v6 = vmul.f32 1.442695, %v1141_v0  ;;  %v1077_v7 = vsub.f32 %v1016_v4, %v2563_v45 }
 0x1d5   : > { %2116 = vpow2.f32 %v1172_v2  ;;  %v1098_v8 = vmul.f32 14.111111, %v1076_v3  ;;  %1990 = vmatprep.mubr.f32.mxu0 %v1202_v5 }
 0x1d6   : > { %v2111_v9 = vpop.eup %2110  ;;  %2118 = vpow2.f32 %v1174_v6  ;;  %v1099_v10 = vmul.f32 14.111111, %v1077_v7 }
 0x1d7   : > { %v1120_v11 = vmul.f32 %v1098_v8, %v1098_v8  ;;  %v1203_v12 = vmul.f32 5.6295214, %v2111_v9 }
 0x1d8   : > { %v1121_v13 = vmul.f32 %v1099_v10, %v1099_v10 }
 0x1d9   : > { %v1142_v14 = vmul.f32 -0.5, %v1120_v11  ;;  %1991 = vmatmul.mubr.f32.gmra.mxu0 %v1203_v12 }
 0x1da   : > { %v2113_v15 = vpop.eup %2112  ;;  %v1143_v16 = vmul.f32 -0.5, %v1121_v13  ;;  %v1021_v17 = vpop.permute.xlu1 %1020 }
 0x1db   : > { %v2115_v18 = vpop.eup %2114  ;;  %v1176_v19 = vmul.f32 1.442695, %v1142_v14  ;;  %v1078_v20 = vsub.f32 %v1021_v17, %v2563_v45  ;;  %v1026_v21 = vpop.permute.xlu0 %1025  ;;  %v1204_v22 = vmul.f32 5.6295214, %v2113_v15 }
 0x1dc   : > { %v1178_v23 = vmul.f32 1.442695, %v1143_v16  ;;  %v1079_v24 = vsub.f32 %v1026_v21, %v2563_v45  ;;  %v1205_v26 = vmul.f32 5.6295214, %v2115_v18 }
 0x1dd   : > { %2120 = vpow2.f32 %v1176_v19  ;;  %v1100_v27 = vmul.f32 14.111111, %v1078_v20  ;;  %1993 = vmatprep.mubr.f32.mxu0 %v1204_v22 }
 0x1de   : > { %2122 = vpow2.f32 %v1178_v23  ;;  %v1101_v28 = vmul.f32 14.111111, %v1079_v24  ;;  %1994 = vmatmul.mubr.f32.gmra.mxu0 %v1205_v26  ;;  %v1537_v23 = vld [vmem:[%s2718_s7 + $0x58] sm:$0xff]  ;;  %v1536_v26 = vld [vmem:[%s2718_s7 + $0x50] sm:$0xff] }
 0x1df   : > { %v1122_v29 = vmul.f32 %v1100_v27, %v1100_v27 }
 0x1e0   : > { %v1123_v31 = vmul.f32 %v1101_v28, %v1101_v28 }
 0x1e1   : > { %v1144_v32 = vmul.f32 -0.5, %v1122_v29 }
 0x1e2   : > { %v2117_v33 = vpop.eup %2116  ;;  %v1145_v34 = vmul.f32 -0.5, %v1123_v31  ;;  %v1031_v36 = vpop.permute.xlu1 %1030  ;;  %v1535_v31 = vld [vmem:[%s2718_s7 + $0x48] sm:$0xff] }
 0x1e3   : > { %v2119_v37 = vpop.eup %2118  ;;  %v1180_v39 = vmul.f32 1.442695, %v1144_v32  ;;  %v1080_v40 = vsub.f32 %v1031_v36, %v2563_v45  ;;  %v1036_v41 = vpop.permute.xlu0 %1035  ;;  %v1206_v42 = vmul.f32 5.6295214, %v2117_v33  ;;  %v1534_v32 = vld [vmem:[%s2718_s7 + $0x40] sm:$0xff]  ;;  %v1533_v33 = vld [vmem:[%s2718_s7 + $0x38] sm:$0xff] }
 0x1e4   : > { %v1182_v25 = vmul.f32 1.442695, %v1145_v34  ;;  %v1081_v30 = vsub.f32 %v1036_v41, %v2563_v45  ;;  %v1207_v43 = vmul.f32 5.6295214, %v2119_v37  ;;  %v1532_v36 = vld [vmem:[%s2718_s7 + $0x30] sm:$0xff]  ;;  %v1531_v41 = vld [vmem:[%s2718_s7 + $0x28] sm:$0xff] }
 0x1e5   : > { %2124 = vpow2.f32 %v1180_v39  ;;  %v1102_v44 = vmul.f32 14.111111, %v1080_v40  ;;  %1996 = vmatprep.mubr.f32.mxu0 %v1206_v42  ;;  %v1530_v42 = vld [vmem:[%s2718_s7 + $0x20] sm:$0xff] }
 0x1e6   : > { %2126 = vpow2.f32 %v1182_v25  ;;  %v1103_v35 = vmul.f32 14.111111, %v1081_v30  ;;  %1997 = vmatmul.mubr.f32.gmra.mxu0 %v1207_v43  ;;  %v1529_v25 = vld [vmem:[%s2718_s7 + $0x18] sm:$0xff]  ;;  %v1528_v30 = vld [vmem:[%s2718_s7 + $0x10] sm:$0xff]  ;;  %v1527_v43 = vld [vmem:[%s2718_s7 + $0x8] sm:$0xff] }
 0x1e7   : > { %v1124_v38 = vmul.f32 %v1102_v44, %v1102_v44  ;;  %v1526_v44 = vld [vmem:[%s2718_s7] sm:$0xff] }
 0x1e8   : > { %v1125_v46 = vmul.f32 %v1103_v35, %v1103_v35  ;;  %v2629_v35 = vld [vmem:[%s2717_s6] ss:$0 sm:$0xff] }
 0x1e9   : > { %v1146_v47 = vmul.f32 -0.5, %v1124_v38 }
 0x1ea   : > { %v2121_v48 = vpop.eup %2120  ;;  %v1147_v49 = vmul.f32 -0.5, %v1125_v46  ;;  %v1041_v50 = vpop.permute.xlu1 %1040 }
 0x1eb   : > { %v2123_v51 = vpop.eup %2122  ;;  %v1184_v52 = vmul.f32 1.442695, %v1146_v47  ;;  %v1082_v53 = vsub.f32 %v1041_v50, %v2563_v45  ;;  %v1046_v54 = vpop.permute.xlu0 %1045  ;;  %v1208_v55 = vmul.f32 5.6295214, %v2121_v48 }
 0x1ec   : > { %v1186_v56 = vmul.f32 1.442695, %v1147_v49  ;;  %v1083_v57 = vsub.f32 %v1046_v54, %v2563_v45  ;;  %v1209_v58 = vmul.f32 5.6295214, %v2123_v51 }
 0x1ed   : > { %2128 = vpow2.f32 %v1184_v52  ;;  %v1104_v59 = vmul.f32 14.111111, %v1082_v53  ;;  %1999 = vmatprep.mubr.f32.mxu0 %v1208_v55 }
 0x1ee   : > { %2130 = vpow2.f32 %v1186_v56  ;;  %v1105_v60 = vmul.f32 14.111111, %v1083_v57  ;;  %2000 = vmatmul.mubr.f32.gmra.mxu0 %v1209_v58 }
 0x1ef   : > { %v1126_v61 = vmul.f32 %v1104_v59, %v1104_v59 }
 0x1f0   : > { %v1127_v62 = vmul.f32 %v1105_v60, %v1105_v60 }
 0x1f1   : > { %v1148_v63 = vmul.f32 -0.5, %v1126_v61 }
 0x1f2   : > { %v2125_v0 = vpop.eup %2124  ;;  %v1149_v1 = vmul.f32 -0.5, %v1127_v62  ;;  %v1051_v2 = vpop.permute.xlu1 %1050 }
 0x1f3   : > { %v2127_v3 = vpop.eup %2126  ;;  %v1188_v4 = vmul.f32 1.442695, %v1148_v63  ;;  %v1084_v5 = vsub.f32 %v1051_v2, %v2563_v45  ;;  %v1056_v6 = vpop.permute.xlu0 %1055  ;;  %v1210_v7 = vmul.f32 5.6295214, %v2125_v0 }
 0x1f4   : > { %v1190_v8 = vmul.f32 1.442695, %v1149_v1  ;;  %v1085_v9 = vsub.f32 %v1056_v6, %v2563_v45  ;;  %v1211_v10 = vmul.f32 5.6295214, %v2127_v3  ;;  %v1538_v45 = vld [vmem:[%s2718_s7 + $0x60] sm:$0xff] }
 0x1f5   : > { %2132 = vpow2.f32 %v1188_v4  ;;  %v1106_v11 = vmul.f32 14.111111, %v1084_v5  ;;  %2002 = vmatprep.mubr.f32.mxu0 %v1210_v7  ;;  %2020 = vmatprep.subr.mxu1 %v1538_v45 }
 0x1f6   : > { %2134 = vpow2.f32 %v1190_v8  ;;  %v1107_v12 = vmul.f32 14.111111, %v1085_v9  ;;  %2003 = vmatmul.mubr.f32.gmra.mxu0 %v1211_v10  ;;  %2021 = vmatpush3.msra.mxu1 %v1538_v45 }
 0x1f7   : > { %v1128_v13 = vmul.f32 %v1106_v11, %v1106_v11  ;;  %2022 = vmatprep.subr.mxu1 %v1537_v23 }
 0x1f8   : > { %v1129_v14 = vmul.f32 %v1107_v12, %v1107_v12  ;;  %2023 = vmatpush3.msra.mxu1 %v1537_v23 }
 0x1f9   : > { %v1150_v15 = vmul.f32 -0.5, %v1128_v13  ;;  %2024 = vmatprep.subr.mxu1 %v1536_v26 }
 0x1fa   : > { %v2129_v16 = vpop.eup %2128  ;;  %v1151_v17 = vmul.f32 -0.5, %v1129_v14  ;;  %2025 = vmatpush3.msra.mxu1 %v1536_v26 }
 0x1fb   : > { %v2131_v18 = vpop.eup %2130  ;;  %v1192_v19 = vmul.f32 1.442695, %v1150_v15  ;;  %v1212_v20 = vmul.f32 5.6295214, %v2129_v16  ;;  %2026 = vmatprep.subr.mxu1 %v1535_v31 }
 0x1fc   : > { %v1194_v21 = vmul.f32 1.442695, %v1151_v17  ;;  %v1213_v22 = vmul.f32 5.6295214, %v2131_v18  ;;  %2027 = vmatpush3.msra.mxu1 %v1535_v31 }
 0x1fd   : > { %2136 = vpow2.f32 %v1192_v19  ;;  %2005 = vmatprep.mubr.f32.mxu0 %v1212_v20  ;;  %2028 = vmatprep.subr.mxu1 %v1534_v32 }
 0x1fe   : > { %2138 = vpow2.f32 %v1194_v21  ;;  %2006 = vmatmul.mubr.f32.gmra.mxu0 %v1213_v22  ;;  %2029 = vmatpush3.msra.mxu1 %v1534_v32 }
 0x1ff   : > { %2030 = vmatprep.subr.mxu1 %v1533_v33 }
 0x200   : > { %2031 = vmatpush3.msra.mxu1 %v1533_v33 }
 0x201   : > { %2032 = vmatprep.subr.mxu1 %v1532_v36 }
 0x202   : > { %v2133_v24 = vpop.eup %2132  ;;  %2033 = vmatpush3.msra.mxu1 %v1532_v36 }
 0x203   : > { %v2135_v27 = vpop.eup %2134  ;;  %v1214_v28 = vmul.f32 5.6295214, %v2133_v24  ;;  %2034 = vmatprep.subr.mxu1 %v1531_v41 }
 0x204   : > { %v1215_v29 = vmul.f32 5.6295214, %v2135_v27  ;;  %2035 = vmatpush3.msra.mxu1 %v1531_v41 }
 0x205   : > { %2008 = vmatprep.mubr.f32.mxu0 %v1214_v28  ;;  %2036 = vmatprep.subr.mxu1 %v1530_v42 }
 0x206   : > { %2009 = vmatmul.mubr.f32.gmra.mxu0 %v1215_v29  ;;  %2037 = vmatpush3.msra.mxu1 %v1530_v42 }
 0x207   : > { %2038 = vmatprep.subr.mxu1 %v1529_v25 }
 0x208   : > { %2039 = vmatpush3.msra.mxu1 %v1529_v25 }
 0x209   : > { %2040 = vmatprep.subr.mxu1 %v1528_v30 }
 0x20a   : > { %v2137_v34 = vpop.eup %2136  ;;  %2041 = vmatpush3.msra.mxu1 %v1528_v30 }
 0x20b   : > { %v2139_v37 = vpop.eup %2138  ;;  %v1216_v39 = vmul.f32 5.6295214, %v2137_v34  ;;  %2042 = vmatprep.subr.mxu1 %v1527_v43 }
 0x20c   : > { %v1217_v40 = vmul.f32 5.6295214, %v2139_v37  ;;  %2043 = vmatpush3.msra.mxu1 %v1527_v43 }
 0x20d   : > { %2011 = vmatprep.mubr.f32.mxu0 %v1216_v39  ;;  %2044 = vmatprep.subr.mxu1 %v1526_v44 }
 0x20e   : > { %2012 = vmatmul.mubr.f32.gmra.mxu0 %v1217_v40  ;;  %2045 = vmatpush3.msra.mxu1 %v1526_v44 }
 0x27f   : > { %v1983_v38 = vpop.f32.mrf.mxu0 }
 0x280   : > { %v1313_v46 = vadd.f32 %v1983_v38, %v2629_v35 }
 0x281   : > { %v1307_v47 = vpop.f32.mrf.mxu0 }
 0x282   : > { %v1439_v48 = vmul.f32 0.70710677, %v1313_v46  ;;  %v1308_v49 = vadd.f32 %v2629_v35, %v1307_v47  ;;  %v1417_v3 = vmul.f32 0.5, %v1313_v46 }
 0x284   : > { %2140 = verf.f32 %v1439_v48  ;;  %v1438_v50 = vmul.f32 0.70710677, %v1308_v49  ;;  %v1416_v1 = vmul.f32 0.5, %v1308_v49 }
 0x286   : > { %2142 = verf.f32 %v1438_v50 }
 0x289   : > { %v1986_v51 = vpop.f32.mrf.mxu0 }
 0x28a   : > { %v1323_v52 = vadd.f32 %v1986_v51, %v2629_v35 }
 0x28b   : > { %v1317_v53 = vpop.f32.mrf.mxu0 }
 0x28c   : > { %v1441_v54 = vmul.f32 0.70710677, %v1323_v52  ;;  %v1318_v55 = vadd.f32 %v2629_v35, %v1317_v53  ;;  %v1419_v19 = vmul.f32 0.5, %v1323_v52 }
 0x28e   : > { %2144 = verf.f32 %v1441_v54  ;;  %v1440_v56 = vmul.f32 0.70710677, %v1318_v55  ;;  %v1418_v15 = vmul.f32 0.5, %v1318_v55 }
 0x290   : > { %2146 = verf.f32 %v1440_v56 }
 0x291   : > { %v2141_v57 = vpop.eup %2140  ;;  %v1989_v58 = vpop.f32.mrf.mxu0 }
 0x292   : > { %v1333_v59 = vadd.f32 %v1989_v58, %v2629_v35  ;;  %v1483_v62 = vadd.f32 1.0, %v2141_v57 }
 0x293   : > { %v2143_v60 = vpop.eup %2142  ;;  %v1327_v61 = vpop.f32.mrf.mxu0 }
 0x294   : > { %v1443_v63 = vmul.f32 0.70710677, %v1333_v59  ;;  %v1328_v0 = vadd.f32 %v2629_v35, %v1327_v61  ;;  %v1482_v2 = vadd.f32 1.0, %v2143_v60  ;;  %v1505_v6 = vmul.f32 %v1483_v62, %v1417_v3 }
 0x295   : > { %v1421_v34 = vmul.f32 0.5, %v1333_v59 }
 0x296   : > { %2148 = verf.f32 %v1443_v63  ;;  %v1442_v4 = vmul.f32 0.70710677, %v1328_v0  ;;  %v1504_v5 = vmul.f32 %v1482_v2, %v1416_v1  ;;  %v1420_v31 = vmul.f32 0.5, %v1328_v0 }
 0x298   : > { %2150 = verf.f32 %v1442_v4  ;;  %2046 = vmatprep.mubr.f32.mxu1 %v1504_v5 }
 0x299   : > { %2047 = vmatmul.mubr.f32.vlgmr.msra.gmra.mxu1 %v1505_v6  ;;  %v1992_v7 = vpop.f32.mrf.mxu0 }
 0x29a   : > { %v1343_v8 = vadd.f32 %v1992_v7, %v2629_v35 }
 0x29b   : > { %v2145_v9 = vpop.eup %2144  ;;  %v1337_v10 = vpop.f32.mrf.mxu0 }
 0x29c   : > { %v1445_v11 = vmul.f32 0.70710677, %v1343_v8  ;;  %v1338_v12 = vadd.f32 %v2629_v35, %v1337_v10  ;;  %v1485_v14 = vadd.f32 1.0, %v2145_v9  ;;  %v1423_v48 = vmul.f32 0.5, %v1343_v8 }
 0x29d   : > { %v2147_v13 = vpop.eup %2146 }
 0x29e   : > { %2152 = verf.f32 %v1445_v11  ;;  %v1444_v16 = vmul.f32 0.70710677, %v1338_v12  ;;  %v1995_v17 = vpop.f32.mrf.mxu0  ;;  %v1484_v18 = vadd.f32 1.0, %v2147_v13  ;;  %v1507_v24 = vmul.f32 %v1485_v14, %v1419_v19 }
 0x29f   : > { %v1353_v20 = vadd.f32 %v1995_v17, %v2629_v35  ;;  %v1422_v38 = vmul.f32 0.5, %v1338_v12 }
 0x2a0   : > { %2154 = verf.f32 %v1444_v16  ;;  %v1347_v21 = vpop.f32.mrf.mxu0  ;;  %v1506_v22 = vmul.f32 %v1484_v18, %v1418_v15 }
 0x2a1   : > { %v1447_v45 = vmul.f32 0.70710677, %v1353_v20  ;;  %v1348_v23 = vadd.f32 %v2629_v35, %v1347_v21  ;;  %v1425_v61 = vmul.f32 0.5, %v1353_v20 }
 0x2a2   : > { %2049 = vmatprep.mubr.f32.mxu1 %v1506_v22 }
 0x2a3   : > { %v2149_v26 = vpop.eup %2148  ;;  %2156 = verf.f32 %v1447_v45  ;;  %v1446_v27 = vmul.f32 0.70710677, %v1348_v23  ;;  %2050 = vmatmul.mubr.f32.gmra.mxu1 %v1507_v24  ;;  %v1424_v58 = vmul.f32 0.5, %v1348_v23 }
 0x2a4   : > { %v1487_v29 = vadd.f32 1.0, %v2149_v26 }
 0x2a5   : > { %v2151_v28 = vpop.eup %2150  ;;  %2158 = verf.f32 %v1446_v27 }
 0x2a6   : > { %v1998_v32 = vpop.f32.mrf.mxu0  ;;  %v1486_v33 = vadd.f32 1.0, %v2151_v28  ;;  %v1509_v42 = vmul.f32 %v1487_v29, %v1421_v34 }
 0x2a7   : > { %v1363_v36 = vadd.f32 %v1998_v32, %v2629_v35 }
 0x2a8   : > { %v1357_v37 = vpop.f32.mrf.mxu0  ;;  %v1508_v39 = vmul.f32 %v1486_v33, %v1420_v31 }
 0x2a9   : > { %v1449_v40 = vmul.f32 0.70710677, %v1363_v36  ;;  %v1358_v41 = vadd.f32 %v2629_v35, %v1357_v37  ;;  %v1427_v11 = vmul.f32 0.5, %v1363_v36 }
 0x2aa   : > { %2052 = vmatprep.mubr.f32.mxu1 %v1508_v39 }
 0x2ab   : > { %v2153_v25 = vpop.eup %2152  ;;  %2160 = verf.f32 %v1449_v40  ;;  %v1448_v30 = vmul.f32 0.70710677, %v1358_v41  ;;  %2053 = vmatmul.mubr.f32.gmra.mxu1 %v1509_v42  ;;  %v1426_v8 = vmul.f32 0.5, %v1358_v41 }
 0x2ac   : > { %v1489_v44 = vadd.f32 1.0, %v2153_v25 }
 0x2ad   : > { %v2155_v43 = vpop.eup %2154  ;;  %2162 = verf.f32 %v1448_v30 }
 0x2ae   : > { %v2001_v46 = vpop.f32.mrf.mxu0  ;;  %v1488_v47 = vadd.f32 1.0, %v2155_v43  ;;  %v1511_v55 = vmul.f32 %v1489_v44, %v1423_v48 }
 0x2af   : > { %v1373_v49 = vadd.f32 %v2001_v46, %v2629_v35 }
 0x2b0   : > { %v2157_v50 = vpop.eup %2156  ;;  %v1367_v51 = vpop.f32.mrf.mxu0  ;;  %v1510_v52 = vmul.f32 %v1488_v47, %v1422_v38 }
 0x2b1   : > { %v1451_v53 = vmul.f32 0.70710677, %v1373_v49  ;;  %v1368_v54 = vadd.f32 %v2629_v35, %v1367_v51  ;;  %v1491_v57 = vadd.f32 1.0, %v2157_v50  ;;  %v1429_v24 = vmul.f32 0.5, %v1373_v49 }
 0x2b2   : > { %v2159_v56 = vpop.eup %2158  ;;  %2055 = vmatprep.mubr.f32.mxu1 %v1510_v52 }
 0x2b3   : > { %2164 = verf.f32 %v1451_v53  ;;  %v1450_v59 = vmul.f32 0.70710677, %v1368_v54  ;;  %2056 = vmatmul.mubr.f32.gmra.mxu1 %v1511_v55  ;;  %v1490_v60 = vadd.f32 1.0, %v2159_v56  ;;  %v1513_v0 = vmul.f32 %v1491_v57, %v1425_v61 }
 0x2b4   : > { %v1428_v22 = vmul.f32 0.5, %v1368_v54 }
 0x2b5   : > { %2166 = verf.f32 %v1450_v59  ;;  %v1512_v62 = vmul.f32 %v1490_v60, %v1424_v58 }
 0x2b6   : > { %v2004_v63 = vpop.f32.mrf.mxu0 }
 0x2b7   : > { %v1383_v1 = vadd.f32 %v2004_v63, %v2629_v35  ;;  %2058 = vmatprep.mubr.f32.mxu1 %v1512_v62 }
 0x2b8   : > { %v2161_v2 = vpop.eup %2160  ;;  %v1377_v3 = vpop.f32.mrf.mxu0  ;;  %2059 = vmatmul.mubr.f32.gmra.mxu1 %v1513_v0 }
 0x2b9   : > { %v1453_v4 = vmul.f32 0.70710677, %v1383_v1  ;;  %v1378_v5 = vadd.f32 %v2629_v35, %v1377_v3  ;;  %v1493_v7 = vadd.f32 1.0, %v2161_v2  ;;  %v1431_v42 = vmul.f32 0.5, %v1383_v1 }
 0x2ba   : > { %v2163_v6 = vpop.eup %2162 }
 0x2bb   : > { %2168 = verf.f32 %v1453_v4  ;;  %v1452_v9 = vmul.f32 0.70710677, %v1378_v5  ;;  %v1492_v10 = vadd.f32 1.0, %v2163_v6  ;;  %v1515_v14 = vmul.f32 %v1493_v7, %v1427_v11 }
 0x2bc   : > { %v1430_v39 = vmul.f32 0.5, %v1378_v5 }
 0x2bd   : > { %2170 = verf.f32 %v1452_v9  ;;  %v1514_v12 = vmul.f32 %v1492_v10, %v1426_v8  ;;  %v2656_v8 = vld [vmem:[%s2719_s8] ss:$0 sm:$0xff] }
 0x2be   : > { %v2007_v13 = vpop.f32.mrf.mxu0 }
 0x2bf   : > { %v1393_v15 = vadd.f32 %v2007_v13, %v2629_v35  ;;  %2061 = vmatprep.mubr.f32.mxu1 %v1514_v12 }
 0x2c0   : > { %v2165_v16 = vpop.eup %2164  ;;  %v1387_v17 = vpop.f32.mrf.mxu0  ;;  %2062 = vmatmul.mubr.f32.gmra.mxu1 %v1515_v14 }
 0x2c1   : > { %v1455_v18 = vmul.f32 0.70710677, %v1393_v15  ;;  %v1388_v19 = vadd.f32 %v2629_v35, %v1387_v17  ;;  %v1495_v21 = vadd.f32 1.0, %v2165_v16  ;;  %v1433_v54 = vmul.f32 0.5, %v1393_v15 }
 0x2c2   : > { %v2167_v20 = vpop.eup %2166 }
 0x2c3   : > { %2172 = verf.f32 %v1455_v18  ;;  %v1454_v45 = vmul.f32 0.70710677, %v1388_v19  ;;  %v1494_v23 = vadd.f32 1.0, %v2167_v20  ;;  %v1517_v28 = vmul.f32 %v1495_v21, %v1429_v24 }
 0x2c4   : > { %v1432_v51 = vmul.f32 0.5, %v1388_v19 }
 0x2c5   : > { %2174 = verf.f32 %v1454_v45  ;;  %v1516_v26 = vmul.f32 %v1494_v23, %v1428_v22 }
 0x2c6   : > { %v2010_v27 = vpop.f32.mrf.mxu0 }
 0x2c7   : > { %v1403_v29 = vadd.f32 %v2010_v27, %v2629_v35  ;;  %2064 = vmatprep.mubr.f32.mxu1 %v1516_v26 }
 0x2c8   : > { %v2169_v31 = vpop.eup %2168  ;;  %v1397_v32 = vpop.f32.mrf.mxu0  ;;  %2065 = vmatmul.mubr.f32.gmra.mxu1 %v1517_v28 }
 0x2c9   : > { %v1457_v33 = vmul.f32 0.70710677, %v1403_v29  ;;  %v1398_v34 = vadd.f32 %v2629_v35, %v1397_v32  ;;  %v1497_v37 = vadd.f32 1.0, %v2169_v31  ;;  %v1435_v62 = vmul.f32 0.5, %v1403_v29 }
 0x2ca   : > { %v2171_v36 = vpop.eup %2170 }
 0x2cb   : > { %2176 = verf.f32 %v1457_v33  ;;  %v1456_v40 = vmul.f32 0.70710677, %v1398_v34  ;;  %v1496_v41 = vadd.f32 1.0, %v2171_v36  ;;  %v1519_v43 = vmul.f32 %v1497_v37, %v1431_v42 }
 0x2cc   : > { %v1434_v60 = vmul.f32 0.5, %v1398_v34 }
 0x2cd   : > { %2178 = verf.f32 %v1456_v40  ;;  %v1518_v25 = vmul.f32 %v1496_v41, %v1430_v39 }
 0x2ce   : > { %v2013_v30 = vpop.f32.mrf.mxu0 }
 0x2cf   : > { %v1413_v44 = vadd.f32 %v2013_v30, %v2629_v35  ;;  %2067 = vmatprep.mubr.f32.mxu1 %v1518_v25 }
 0x2d0   : > { %v2173_v38 = vpop.eup %2172  ;;  %v1407_v46 = vpop.f32.mrf.mxu0  ;;  %2068 = vmatmul.mubr.f32.gmra.mxu1 %v1519_v43 }
 0x2d1   : > { %v1459_v47 = vmul.f32 0.70710677, %v1413_v44  ;;  %v1408_v48 = vadd.f32 %v2629_v35, %v1407_v46  ;;  %v1499_v50 = vadd.f32 1.0, %v2173_v38  ;;  %v1437_v5 = vmul.f32 0.5, %v1413_v44 }
 0x2d2   : > { %v2175_v49 = vpop.eup %2174 }
 0x2d3   : > { %2180 = verf.f32 %v1459_v47  ;;  %v1458_v52 = vmul.f32 0.70710677, %v1408_v48  ;;  %v1498_v53 = vadd.f32 1.0, %v2175_v49  ;;  %v1521_v56 = vmul.f32 %v1499_v50, %v1433_v54 }
 0x2d4   : > { %v1436_v3 = vmul.f32 0.5, %v1408_v48 }
 0x2d5   : > { %2182 = verf.f32 %v1458_v52  ;;  %v1520_v55 = vmul.f32 %v1498_v53, %v1432_v51 }
 0x2d7   : > { %2070 = vmatprep.mubr.f32.mxu1 %v1520_v55 }
 0x2d8   : > { %v2177_v57 = vpop.eup %2176  ;;  %2071 = vmatmul.mubr.f32.gmra.mxu1 %v1521_v56 }
 0x2d9   : > { %v1501_v59 = vadd.f32 1.0, %v2177_v57 }
 0x2da   : > { %v2179_v58 = vpop.eup %2178 }
 0x2db   : > { %v1500_v61 = vadd.f32 1.0, %v2179_v58  ;;  %v1523_v63 = vmul.f32 %v1501_v59, %v1435_v62 }
 0x2dd   : > { %v1522_v35 = vmul.f32 %v1500_v61, %v1434_v60 }
 0x2df   : > { %2073 = vmatprep.mubr.f32.mxu1 %v1522_v35 }
 0x2e0   : > { %v2181_v0 = vpop.eup %2180  ;;  %2074 = vmatmul.mubr.f32.gmra.mxu1 %v1523_v63 }
 0x2e1   : > { %v1503_v2 = vadd.f32 1.0, %v2181_v0 }
 0x2e2   : > { %v2183_v1 = vpop.eup %2182 }
 0x2e3   : > { %v1502_v4 = vadd.f32 1.0, %v2183_v1  ;;  %v1525_v7 = vmul.f32 %v1503_v2, %v1437_v5 }
 0x2e5   : > { %v1524_v6 = vmul.f32 %v1502_v4, %v1436_v3 }
 0x2e7   : > { %2076 = vmatprep.mubr.f32.mxu1 %v1524_v6 }
 0x2e8   : > { %2077 = vmatmul.mubr.f32.gmra.mxu1 %v1525_v7 }
 0x359   : > { %v2048_v9 = vpop.f32.mrf.mxu1 }
 0x35a   : > { %v1621_v10 = vadd.f32 %v2048_v9, %v2656_v8 }
 0x35b   : > { %v1615_v11 = vpop.f32.mrf.mxu1 }
 0x35c   : > { %1725 = vst [vmem:[%s2662_s20 + $0x8] sm:$0xff] %v1621_v10  ;;  %v1616_v12 = vadd.f32 %v2656_v8, %v1615_v11 }
 0x35e   : > { %1724 = vst [vmem:[%s2662_s20] sm:$0xff] %v1616_v12 }
 0x363   : > { %v2051_v13 = vpop.f32.mrf.mxu1 }
 0x364   : > { %v1631_v14 = vadd.f32 %v2051_v13, %v2656_v8 }
 0x365   : > { %v1625_v15 = vpop.f32.mrf.mxu1 }
 0x366   : > { %1727 = vst [vmem:[%s2662_s20 + $0x18] sm:$0xff] %v1631_v14  ;;  %v1626_v16 = vadd.f32 %v2656_v8, %v1625_v15 }
 0x368   : > { %1726 = vst [vmem:[%s2662_s20 + $0x10] sm:$0xff] %v1626_v16 }
 0x36b   : > { %v2054_v17 = vpop.f32.mrf.mxu1 }
 0x36c   : > { %v1641_v18 = vadd.f32 %v2054_v17, %v2656_v8 }
 0x36d   : > { %v1635_v19 = vpop.f32.mrf.mxu1 }
 0x36e   : > { %1729 = vst [vmem:[%s2662_s20 + $0x28] sm:$0xff] %v1641_v18  ;;  %v1636_v20 = vadd.f32 %v2656_v8, %v1635_v19 }
 0x370   : > { %1728 = vst [vmem:[%s2662_s20 + $0x20] sm:$0xff] %v1636_v20 }
 0x373   : > { %v2057_v21 = vpop.f32.mrf.mxu1 }
 0x374   : > { %v1651_v22 = vadd.f32 %v2057_v21, %v2656_v8 }
 0x375   : > { %v1645_v45 = vpop.f32.mrf.mxu1 }
 0x376   : > { %1731 = vst [vmem:[%s2662_s20 + $0x38] sm:$0xff] %v1651_v22  ;;  %v1646_v23 = vadd.f32 %v2656_v8, %v1645_v45 }
 0x378   : > { %1730 = vst [vmem:[%s2662_s20 + $0x30] sm:$0xff] %v1646_v23  ;;  %v2060_v24 = vpop.f32.mrf.mxu1 }
 0x379   : > { %v1661_v26 = vadd.f32 %v2060_v24, %v2656_v8 }
 0x37a   : > { %v1655_v27 = vpop.f32.mrf.mxu1 }
 0x37b   : > { %1733 = vst [vmem:[%s2662_s20 + $0x48] sm:$0xff] %v1661_v26  ;;  %v1656_v28 = vadd.f32 %v2656_v8, %v1655_v27 }
 0x37d   : > { %1732 = vst [vmem:[%s2662_s20 + $0x40] sm:$0xff] %v1656_v28 }
 0x380   : > { %v2063_v29 = vpop.f32.mrf.mxu1 }
 0x381   : > { %v1671_v31 = vadd.f32 %v2063_v29, %v2656_v8 }
 0x382   : > { %v1665_v32 = vpop.f32.mrf.mxu1 }
 0x383   : > { %1735 = vst [vmem:[%s2662_s20 + $0x58] sm:$0xff] %v1671_v31  ;;  %v1666_v33 = vadd.f32 %v2656_v8, %v1665_v32 }
 0x385   : > { %1734 = vst [vmem:[%s2662_s20 + $0x50] sm:$0xff] %v1666_v33 }
 0x388   : > { %v2066_v34 = vpop.f32.mrf.mxu1 }
 0x389   : > { %v1681_v36 = vadd.f32 %v2066_v34, %v2656_v8 }
 0x38a   : > { %v1675_v37 = vpop.f32.mrf.mxu1 }
 0x38b   : > { %1737 = vst [vmem:[%s2662_s20 + $0x68] sm:$0xff] %v1681_v36  ;;  %v1676_v39 = vadd.f32 %v2656_v8, %v1675_v37 }
 0x38d   : > { %1736 = vst [vmem:[%s2662_s20 + $0x60] sm:$0xff] %v1676_v39 }
 0x390   : > { %v2069_v40 = vpop.f32.mrf.mxu1 }
 0x391   : > { %v1691_v41 = vadd.f32 %v2069_v40, %v2656_v8 }
 0x392   : > { %v1685_v42 = vpop.f32.mrf.mxu1 }
 0x393   : > { %1739 = vst [vmem:[%s2662_s20 + $0x78] sm:$0xff] %v1691_v41  ;;  %v1686_v25 = vadd.f32 %v2656_v8, %v1685_v42 }
 0x395   : > { %1738 = vst [vmem:[%s2662_s20 + $0x70] sm:$0xff] %v1686_v25 }
 0x398   : > { %v2072_v30 = vpop.f32.mrf.mxu1 }
 0x399   : > { %v1701_v43 = vadd.f32 %v2072_v30, %v2656_v8 }
 0x39a   : > { %v1695_v44 = vpop.f32.mrf.mxu1 }
 0x39b   : > { %1741 = vst [vmem:[%s2662_s20 + $0x88] sm:$0xff] %v1701_v43  ;;  %v1696_v38 = vadd.f32 %v2656_v8, %v1695_v44 }
 0x39d   : > { %1740 = vst [vmem:[%s2662_s20 + $0x80] sm:$0xff] %v1696_v38 }
 0x3a0   : > { %v2075_v46 = vpop.f32.mrf.mxu1 }
 0x3a1   : > { %v1711_v47 = vadd.f32 %v2075_v46, %v2656_v8 }
 0x3a2   : > { %v1705_v48 = vpop.f32.mrf.mxu1 }
 0x3a3   : > { %1743 = vst [vmem:[%s2662_s20 + $0x98] sm:$0xff] %v1711_v47  ;;  %v1706_v49 = vadd.f32 %v2656_v8, %v1705_v48 }
 0x3a5   : > { %1742 = vst [vmem:[%s2662_s20 + $0x90] sm:$0xff] %v1706_v49 }
 0x3a8   : > { %v2078_v50 = vpop.f32.mrf.mxu1 }
 0x3a9   : > { %v1721_v51 = vadd.f32 %v2078_v50, %v2656_v8 }
 0x3aa   : > { %v1715_v52 = vpop.f32.mrf.mxu1 }
 0x3ab   : > { %1745 = vst [vmem:[%s2662_s20 + $0xa8] sm:$0xff] %v1721_v51  ;;  %v1716_v53 = vadd.f32 %v2656_v8, %v1715_v52 }
 0x3ad   : > { %1744 = vst [vmem:[%s2662_s20 + $0xa0] sm:$0xff] %v1716_v53 }
 0x3ae PF: > { %s19_s30 = sadd.s32 1, %s2190_s30  }
 0x3af   : > { %p16_p4 = scmp.ge.s32.totalorder %s19_s30, 4  }
 0x3b1   :  { %18 = sbr.rel (!%p16_p4) target bundleno = 1 (0x1), region = 89 }

</bundles_post_ra>
